<compile_context>
chip_gen: v7x
topology: tpu7x:2x2x1
jax: 0.10.0
libtpu: 0.0.40
codegen_flags: <defaults>
</compile_context>

<pallas_src>
import jax
import jax.numpy as jnp
from jax.experimental import pallas as pl
from jax.experimental.pallas import tpu as pltpu

# ----------------------------- config (small) --------------------------------
N_ITEMS = 50      # n_items
EMB = 32          # embedding_size
SEQ = 8           # max_seq_length
N_H = 4           # n_h
N_V = 2           # n_v
BATCH = 16
B_TILE = 8        # sequences per grid step (batch tile)
FC_IN = N_V * EMB + N_H * SEQ   # fc1 input dim


# ------------------------------- Pallas kernel -------------------------------
def caser_kernel(ids_ref, table_ref, wh_ref, wfold_ref, w1h_ref,
                 bh_ref, b1_ref, mask_ref, out_ref):
    BLt = ids_ref.shape[0]                # B_TILE * L
    n_pad, E = table_ref.shape            # padded vocab, embedding dim
    LE, Lnh = wh_ref.shape                # (L*E, L*n_h)
    L = LE // E
    Bt = BLt // L
    e_out = out_ref.shape[1]

    # ---- fused embedding gather: one-hot (BLt, n_pad) @ table on the MXU ----
    # TODO(synk): for a large real vocab, replace the one-hot matmul with a manual
    # DMA gather (memory_space=pl.ANY table + scalar-prefetched ids); one-hot only
    # makes sense for tiny item tables like this demo.
    ids = ids_ref[...]                                               # (BLt, 1) int32
    iota = jax.lax.broadcasted_iota(jnp.int32, (BLt, n_pad), 1)
    one_hot = jnp.where(iota == ids, 1.0, 0.0).astype(jnp.bfloat16)  # exact 0/1
    emb = jnp.dot(one_hot, table_ref[...],
                  preferred_element_type=jnp.float32)                # (BLt, E) f32

    # ---- im2col windows as a VALUE (no scratch, no partial stores) ----
    # windows[b*L + t, dl*E + e] = emb[b*L + t + dl, e]   (zeros past the tile end).
    # Rows with t + dl >= L contain the NEXT sequence's embeddings (or the zero pad).
    # That is correct ONLY because (a) those window column blocks multiply the
    # all-zero rows of wh_all for kernel_idx < dl, and (b) conv outputs at
    # t + kernel_idx >= L are zeroed by `mask` AFTER ReLU (values >= 0) and before
    # the max-pool.  Do not change the wh_all packing, the mask, or the pooling
    # without revisiting this.
    emb_pad = jnp.concatenate([emb, jnp.zeros((L, E), jnp.float32)], axis=0)
    pieces = [emb_pad[dl:dl + BLt, :] for dl in range(L)]            # shifted slices
    windows = jnp.concatenate(pieces, axis=-1).astype(jnp.bfloat16)  # (BLt, L*E)

    # ---- every horizontal conv (all kernel heights, all heads) in ONE matmul ----
    conv = jnp.dot(windows, wh_ref[...],
                   preferred_element_type=jnp.float32)               # (BLt, L*n_h)
    conv = jnp.maximum(conv + bh_ref[...], 0.0)                      # bias + ReLU (f32)
    conv3 = conv.reshape(Bt, L, Lnh) * mask_ref[...]                 # zero invalid t
    pool = jnp.max(conv3, axis=1)                                    # (Bt, L*n_h)

    # ---- vertical conv + its fc1 slice (pre-folded into wfold at pack time) ----
    # Only the t == 0 row of each sequence multiplies the full flattened embedding;
    # select it with an iota compare + sublane sum (no strided row gather).
    fcv_rows = jnp.dot(windows, wfold_ref[...],
                       preferred_element_type=jnp.float32)           # (BLt, e_out)
    fcv3 = fcv_rows.reshape(Bt, L, e_out)
    t_is0 = jax.lax.broadcasted_iota(jnp.int32, fcv3.shape, 1) == 0
    fc_v = jnp.sum(jnp.where(t_is0, fcv3, 0.0), axis=1)              # (Bt, e_out)

    # ---- fc1 horizontal part + output ----
    fc_h = jnp.dot(pool.astype(jnp.bfloat16), w1h_ref[...],
                   preferred_element_type=jnp.float32)               # (Bt, e_out)

    # dropout is identity in eval mode; final activation is ReLU.
    # TODO(synk): for large serving batches, pack the output lane-dense
    # (e.g. (Bt/4, 4*e_out)) and un-pack in the wrapper to avoid masked 32-lane stores.
    out_ref[...] = jnp.maximum(fc_v + fc_h + b1_ref[...], 0.0).astype(out_ref.dtype)


# ------------------------------- wrapper / glue -------------------------------
def _const_spec(shape):
    return pl.BlockSpec(shape, lambda i: (0,) * len(shape))


def pack_caser_params(params):
    """One-time weight repacking, hoisted out of the per-call forward path."""
    emb_table = params["emb_table"].astype(jnp.float32)
    n_items, E = emb_table.shape
    n_v = params["conv_v_w"].shape[0]
    L = params["conv_v_w"].shape[2]
    n_h = params["conv_h_w"][0].shape[0]
    fc1_w = params["fc1_w"].astype(jnp.float32)          # (E_out, n_v*E + L*n_h)
    e_out = fc1_w.shape[0]

    # pad the vocab to a layout-friendly multiple; padded rows are never selected.
    n_pad = ((n_items + 15) // 16) * 16
    table_pad = jnp.zeros((n_pad, E), jnp.float32).at[:n_items].set(emb_table)

    # --- fold conv_v (no activation) + its fc1 slice into a single weight/bias ---
    wv = params["conv_v_w"][:, 0, :, 0].astype(jnp.float32)      # (n_v, L)
    w1v = fc1_w[:, : n_v * E].reshape(e_out, n_v, E)             # (o, v, e)
    w_fold = jnp.einsum("vl,ove->leo", wv, w1v).reshape(L * E, e_out)
    b_fold = jnp.einsum("v,ove->o", params["conv_v_b"].astype(jnp.float32), w1v)

    # --- pack all horizontal-conv weights into one (L*E, L*n_h) matrix ---
    # rows are (dl, e) of the window, cols are (kernel_idx, head); rows with
    # dl > kernel_idx stay zero (this is what makes cross-sequence window reads safe).
    wh_all = jnp.zeros((L * E, L * n_h), jnp.float32)
    for idx in range(L):
        w = params["conv_h_w"][idx][:, 0, :, :].astype(jnp.float32)   # (n_h, idx+1, E)
        blk = jnp.transpose(w, (1, 2, 0)).reshape((idx + 1) * E, n_h)
        wh_all = wh_all.at[: (idx + 1) * E, idx * n_h:(idx + 1) * n_h].set(blk)
    bh_flat = jnp.stack([b.astype(jnp.float32) for b in params["conv_h_b"]],
                        axis=0).reshape(1, L * n_h)

    w1h = fc1_w[:, n_v * E:].T                                   # (L*n_h, E_out)
    b1 = (params["fc1_b"].astype(jnp.float32) + b_fold).reshape(1, e_out)

    # validity mask: conv output at time t for kernel height k+1 exists iff t + k < L
    t = jnp.arange(L)[:, None]
    k = (jnp.arange(L * n_h) // n_h)[None, :]
    mask = (t + k < L).astype(jnp.float32)                       # (L, L*n_h)

    return dict(
        table=table_pad.astype(jnp.bfloat16),      # bf16 weights: half DMA/VMEM,
        wh_all=wh_all.astype(jnp.bfloat16),        # native-rate MXU; f32 accumulate
        w_fold=w_fold.astype(jnp.bfloat16),
        w1h=w1h.astype(jnp.bfloat16),
        bh=bh_flat, b1=b1, mask=mask, L=L, E=E)


def caser_forward(item_seq, packed, *, batch_tile=B_TILE):
    B, L = item_seq.shape
    e_out = packed["b1"].shape[1]
    assert B % batch_tile == 0, (B, batch_tile)
    n_tiles = B // batch_tile

    # only the raw ids cross the pallas_call boundary; the gather happens in-kernel.
    ids = item_seq.reshape(B * L, 1).astype(jnp.int32)

    weights = (packed["table"], packed["wh_all"], packed["w_fold"], packed["w1h"],
               packed["bh"], packed["b1"], packed["mask"])

    in_specs = ([pl.BlockSpec((batch_tile * L, 1), lambda i: (i, 0))]
                + [_const_spec(w.shape) for w in weights])
    out_specs = pl.BlockSpec((batch_tile, e_out), lambda i: (i, 0))

    # Weights keep constant block indices -> stay VMEM resident across grid steps;
    # id/out tiles stream per step.  For much larger batch tiles, raise the scoped
    # VMEM limit via pltpu.CompilerParams(vmem_limit_bytes=...) (not needed here).
    return pl.pallas_call(
        caser_kernel,
        out_shape=jax.ShapeDtypeStruct((B, e_out), jnp.float32),
        grid=(n_tiles,),
        in_specs=in_specs,
        out_specs=out_specs,
        compiler_params=pltpu.CompilerParams(dimension_semantics=("parallel",)),
    )(ids, *weights)


# ------------------------------ pure-JAX reference ----------------------------
def caser_ref(item_seq, params):
    emb = jnp.take(params["emb_table"], item_seq, axis=0)                # (B, L, E)
    B, L, E = emb.shape
    # vertical conv (no activation)
    out_v = jnp.einsum("ble,vl->bve", emb, params["conv_v_w"][:, 0, :, 0])
    out_v = out_v + params["conv_v_b"][None, :, None]
    out_v = out_v.reshape(B, -1)                                         # (B, n_v*E)
    # horizontal convs: relu + max-pool over time
    out_hs = []
    for idx in range(L):
        w = params["conv_h_w"][idx][:, 0, :, :]                          # (n_h, i, E)
        i = idx + 1
        T = L - i + 1
        cols = []
        for t in range(T):
            cols.append(jnp.einsum("bde,cde->bc", emb[:, t:t + i, :], w))
        conv = jnp.stack(cols, axis=2)                                   # (B, n_h, T)
        conv = jax.nn.relu(conv + params["conv_h_b"][idx][None, :, None])
        out_hs.append(jnp.max(conv, axis=2))                             # (B, n_h)
    out_h = jnp.concatenate(out_hs, axis=1)
    out = jnp.concatenate([out_v, out_h], axis=1)                        # (B, FC_IN)
    return jax.nn.relu(out @ params["fc1_w"].T + params["fc1_b"])


# ------------------------------ param init (synthetic) ------------------------
def init_params(key):
    ks = jax.random.split(key, 4 + 2 * SEQ)
    emb_table = jax.random.normal(ks[0], (N_ITEMS, EMB), jnp.float32) * (1.0 / EMB)
    conv_v_w = jax.random.normal(ks[1], (N_V, 1, SEQ, 1), jnp.float32) * 0.1
    conv_v_b = jax.random.normal(ks[2], (N_V,), jnp.float32) * 0.1
    conv_h_w, conv_h_b = [], []
    for i in range(SEQ):
        conv_h_w.append(jax.random.normal(ks[4 + 2 * i], (N_H, 1, i + 1, EMB),
                                          jnp.float32) * 0.1)
        conv_h_b.append(jax.random.normal(ks[4 + 2 * i + 1], (N_H,),
                                          jnp.float32) * 0.1)
    fc1_w = jax.random.normal(ks[3], (EMB, FC_IN), jnp.float32) * (1.0 / jnp.sqrt(FC_IN))
    fc1_b = jnp.zeros((EMB,), jnp.float32)                               # constant_(0)
    return dict(emb_table=emb_table, conv_v_w=conv_v_w, conv_v_b=conv_v_b,
                conv_h_w=conv_h_w, conv_h_b=conv_h_b, fc1_w=fc1_w, fc1_b=fc1_b)


# ------------------------------------ main ------------------------------------
if __name__ == "__main__":
    key = jax.random.PRNGKey(0)
    pkey, skey = jax.random.split(key)
    params = init_params(pkey)
    item_seq = jax.random.randint(skey, (BATCH, SEQ), 0, N_ITEMS, dtype=jnp.int32)

    packed = pack_caser_params(params)            # one-time weight prep (hoisted)
    out = jax.block_until_ready(caser_forward(item_seq, packed))
    ref = jax.block_until_ready(caser_ref(item_seq, params))

    assert out.shape == (BATCH, EMB), out.shape
    # atol slightly above pure-f32 (2e-3) because packed weights / MXU inputs are bf16;
    # accumulation and the epilogue remain f32.
    err = jnp.max(jnp.abs(out - ref))
    assert jnp.allclose(out, ref, rtol=1e-2, atol=2e-3), f"max abs diff = {err}"
    print("KERNEL_OK")
</pallas_src>

<mosaic_0001>
module attributes {stable_mosaic.version = 11 : i64} {
  func.func @caser_kernel(%arg0: i32, %arg1: memref<64x1xi32, #tpu.memory_space<vmem>>, %arg2: memref<64x32xbf16, #tpu.memory_space<vmem>>, %arg3: memref<256x32xbf16, #tpu.memory_space<vmem>>, %arg4: memref<256x32xbf16, #tpu.memory_space<vmem>>, %arg5: memref<32x32xbf16, #tpu.memory_space<vmem>>, %arg6: memref<1x32xf32, #tpu.memory_space<vmem>>, %arg7: memref<1x32xf32, #tpu.memory_space<vmem>>, %arg8: memref<8x32xf32, #tpu.memory_space<vmem>>, %arg9: memref<8x32xf32, #tpu.memory_space<vmem>>) attributes {dimension_semantics = [#tpu.dimension_semantics<parallel>], iteration_bounds = array<i64: 2>, scalar_prefetch = 0 : i64, scratch_operands = 0 : i64, tpu.core_type = #tpu.core_type<tc>, window_params = [{transform_indices = @transform_0, window_bounds = array<i64: 64, 1>}, {pipeline_mode = #tpu.pipeline_mode<synchronous>, transform_indices = @transform_1, window_bounds = array<i64: 64, 32>}, {pipeline_mode = #tpu.pipeline_mode<synchronous>, transform_indices = @transform_2, window_bounds = array<i64: 256, 32>}, {pipeline_mode = #tpu.pipeline_mode<synchronous>, transform_indices = @transform_3, window_bounds = array<i64: 256, 32>}, {pipeline_mode = #tpu.pipeline_mode<synchronous>, transform_indices = @transform_4, window_bounds = array<i64: 32, 32>}, {pipeline_mode = #tpu.pipeline_mode<synchronous>, transform_indices = @transform_5, window_bounds = array<i64: 1, 32>}, {pipeline_mode = #tpu.pipeline_mode<synchronous>, transform_indices = @transform_6, window_bounds = array<i64: 1, 32>}, {pipeline_mode = #tpu.pipeline_mode<synchronous>, transform_indices = @transform_7, window_bounds = array<i64: 8, 32>}, {transform_indices = @transform_8, window_bounds = array<i64: 8, 32>}]} {
    %c0 = arith.constant 0 : index
    %c0_0 = arith.constant 0 : index
    %0 = vector.load %arg1[%c0, %c0_0] : memref<64x1xi32, #tpu.memory_space<vmem>>, vector<64x1xi32>
    %1 = tpu.iota {dimensions = array<i32: 1>} : vector<64x64xi32>
    %2 = vector.broadcast %0 : vector<64x1xi32> to vector<64x64xi32>
    %3 = arith.cmpi eq, %1, %2 : vector<64x64xi32>
    %cst = arith.constant 1.000000e+00 : f32
    %cst_1 = arith.constant 0.000000e+00 : f32
    %4 = vector.broadcast %cst : f32 to vector<64x64xf32>
    %5 = vector.broadcast %cst_1 : f32 to vector<64x64xf32>
    %6 = arith.select %3, %4, %5 : vector<64x64xi1>, vector<64x64xf32>
    %7 = arith.truncf %6 : vector<64x64xf32> to vector<64x64xbf16>
    %c0_2 = arith.constant 0 : index
    %c0_3 = arith.constant 0 : index
    %8 = vector.load %arg2[%c0_2, %c0_3] : memref<64x32xbf16, #tpu.memory_space<vmem>>, vector<64x32xbf16>
    %cst_4 = arith.constant dense<0.000000e+00> : vector<64x32xf32>
    %9 = tpu.matmul %7, %8, %cst_4 {dimension_numbers = #tpu.dot_dimension_numbers<[1], [0], [0], [1], [0, 0, 1, 1], [], []>} : vector<64x64xbf16>, vector<64x32xbf16>, vector<64x32xf32> -> vector<64x32xf32>
    %cst_5 = arith.constant 0.000000e+00 : f32
    %10 = vector.broadcast %cst_5 : f32 to vector<8x32xf32>
    %11 = tpu.concatenate %9, %10 in 0 : vector<64x32xf32>, vector<8x32xf32> -> vector<72x32xf32>
    %12 = vector.extract_strided_slice %11 {offsets = [0, 0], sizes = [64, 32], strides = [1, 1]} : vector<72x32xf32> to vector<64x32xf32>
    %13 = vector.extract_strided_slice %11 {offsets = [1, 0], sizes = [64, 32], strides = [1, 1]} : vector<72x32xf32> to vector<64x32xf32>
    %14 = vector.extract_strided_slice %11 {offsets = [2, 0], sizes = [64, 32], strides = [1, 1]} : vector<72x32xf32> to vector<64x32xf32>
    %15 = vector.extract_strided_slice %11 {offsets = [3, 0], sizes = [64, 32], strides = [1, 1]} : vector<72x32xf32> to vector<64x32xf32>
    %16 = vector.extract_strided_slice %11 {offsets = [4, 0], sizes = [64, 32], strides = [1, 1]} : vector<72x32xf32> to vector<64x32xf32>
    %17 = vector.extract_strided_slice %11 {offsets = [5, 0], sizes = [64, 32], strides = [1, 1]} : vector<72x32xf32> to vector<64x32xf32>
    %18 = vector.extract_strided_slice %11 {offsets = [6, 0], sizes = [64, 32], strides = [1, 1]} : vector<72x32xf32> to vector<64x32xf32>
    %19 = vector.extract_strided_slice %11 {offsets = [7, 0], sizes = [64, 32], strides = [1, 1]} : vector<72x32xf32> to vector<64x32xf32>
    %20 = tpu.concatenate %12, %13, %14, %15, %16, %17, %18, %19 in 1 : vector<64x32xf32>, vector<64x32xf32>, vector<64x32xf32>, vector<64x32xf32>, vector<64x32xf32>, vector<64x32xf32>, vector<64x32xf32>, vector<64x32xf32> -> vector<64x256xf32>
    %21 = arith.truncf %20 : vector<64x256xf32> to vector<64x256xbf16>
    %c0_6 = arith.constant 0 : index
    %c0_7 = arith.constant 0 : index
    %22 = vector.load %arg3[%c0_6, %c0_7] : memref<256x32xbf16, #tpu.memory_space<vmem>>, vector<256x32xbf16>
    %cst_8 = arith.constant dense<0.000000e+00> : vector<64x32xf32>
    %23 = tpu.matmul %21, %22, %cst_8 {dimension_numbers = #tpu.dot_dimension_numbers<[1], [0], [0], [1], [0, 0, 1, 1], [], []>} : vector<64x256xbf16>, vector<256x32xbf16>, vector<64x32xf32> -> vector<64x32xf32>
    %c0_9 = arith.constant 0 : index
    %c0_10 = arith.constant 0 : index
    %24 = vector.load %arg6[%c0_9, %c0_10] : memref<1x32xf32, #tpu.memory_space<vmem>>, vector<1x32xf32>
    %25 = vector.broadcast %24 : vector<1x32xf32> to vector<64x32xf32>
    %26 = arith.addf %23, %25 : vector<64x32xf32>
    %cst_11 = arith.constant 0.000000e+00 : f32
    %27 = vector.broadcast %cst_11 : f32 to vector<64x32xf32>
    %28 = arith.maximumf %26, %27 : vector<64x32xf32>
    %29 = vector.shape_cast %28 : vector<64x32xf32> to vector<8x8x32xf32>
    %c0_12 = arith.constant 0 : index
    %c0_13 = arith.constant 0 : index
    %30 = vector.load %arg8[%c0_12, %c0_13] : memref<8x32xf32, #tpu.memory_space<vmem>>, vector<8x32xf32>
    %31 = vector.shape_cast %30 : vector<8x32xf32> to vector<1x8x32xf32>
    %32 = vector.broadcast %31 : vector<1x8x32xf32> to vector<8x8x32xf32>
    %33 = arith.mulf %29, %32 : vector<8x8x32xf32>
    %cst_14 = arith.constant dense<0xFF800000> : vector<8x32xf32>
    %34 = vector.multi_reduction <maximumf>, %33, %cst_14 [1] : vector<8x8x32xf32> to vector<8x32xf32>
    %c0_15 = arith.constant 0 : index
    %c0_16 = arith.constant 0 : index
    %35 = vector.load %arg4[%c0_15, %c0_16] : memref<256x32xbf16, #tpu.memory_space<vmem>>, vector<256x32xbf16>
    %cst_17 = arith.constant dense<0.000000e+00> : vector<64x32xf32>
    %36 = tpu.matmul %21, %35, %cst_17 {dimension_numbers = #tpu.dot_dimension_numbers<[1], [0], [0], [1], [0, 0, 1, 1], [], []>} : vector<64x256xbf16>, vector<256x32xbf16>, vector<64x32xf32> -> vector<64x32xf32>
    %37 = vector.shape_cast %36 : vector<64x32xf32> to vector<8x8x32xf32>
    %38 = tpu.iota {dimensions = array<i32: 1>} : vector<8x8x32xi32>
    %c0_i32 = arith.constant 0 : i32
    %39 = vector.broadcast %c0_i32 : i32 to vector<8x8x32xi32>
    %40 = arith.cmpi eq, %38, %39 : vector<8x8x32xi32>
    %cst_18 = arith.constant 0.000000e+00 : f32
    %41 = vector.broadcast %cst_18 : f32 to vector<8x8x32xf32>
    %42 = arith.select %40, %37, %41 : vector<8x8x32xi1>, vector<8x8x32xf32>
    %cst_19 = arith.constant dense<0.000000e+00> : vector<8x32xf32>
    %43 = vector.multi_reduction <add>, %42, %cst_19 [1] : vector<8x8x32xf32> to vector<8x32xf32>
    %44 = arith.truncf %34 : vector<8x32xf32> to vector<8x32xbf16>
    %c0_20 = arith.constant 0 : index
    %c0_21 = arith.constant 0 : index
    %45 = vector.load %arg5[%c0_20, %c0_21] : memref<32x32xbf16, #tpu.memory_space<vmem>>, vector<32x32xbf16>
    %cst_22 = arith.constant dense<0.000000e+00> : vector<8x32xf32>
    %46 = tpu.matmul %44, %45, %cst_22 {dimension_numbers = #tpu.dot_dimension_numbers<[1], [0], [0], [1], [0, 0, 1, 1], [], []>} : vector<8x32xbf16>, vector<32x32xbf16>, vector<8x32xf32> -> vector<8x32xf32>
    %47 = arith.addf %43, %46 : vector<8x32xf32>
    %c0_23 = arith.constant 0 : index
    %c0_24 = arith.constant 0 : index
    %48 = vector.load %arg7[%c0_23, %c0_24] : memref<1x32xf32, #tpu.memory_space<vmem>>, vector<1x32xf32>
    %49 = vector.broadcast %48 : vector<1x32xf32> to vector<8x32xf32>
    %50 = arith.addf %47, %49 : vector<8x32xf32>
    %cst_25 = arith.constant 0.000000e+00 : f32
    %51 = vector.broadcast %cst_25 : f32 to vector<8x32xf32>
    %52 = arith.maximumf %50, %51 : vector<8x32xf32>
    %c0_26 = arith.constant 0 : index
    %c0_27 = arith.constant 0 : index
    %53 = vector.load %arg9[%c0_26, %c0_27] : memref<8x32xf32, #tpu.memory_space<vmem>>, vector<8x32xf32>
    tpu.vector_store %arg9[%c0_26, %c0_27], %52 {strides = array<i32>} : memref<8x32xf32, #tpu.memory_space<vmem>>, vector<8x32xf32>,
    return
  }
  func.func @transform_0(%arg0: i32) -> (i32, i32) {
    %c0_i32 = arith.constant 0 : i32
    %c0_i32_0 = arith.constant 0 : i32
    return %arg0, %c0_i32 : i32, i32
  }
  func.func @transform_1(%arg0: i32) -> (i32, i32) {
    %c0_i32 = arith.constant 0 : i32
    %c0_i32_0 = arith.constant 0 : i32
    %c0_i32_1 = arith.constant 0 : i32
    return %c0_i32, %c0_i32_0 : i32, i32
  }
  func.func @transform_2(%arg0: i32) -> (i32, i32) {
    %c0_i32 = arith.constant 0 : i32
    %c0_i32_0 = arith.constant 0 : i32
    %c0_i32_1 = arith.constant 0 : i32
    return %c0_i32, %c0_i32_0 : i32, i32
  }
  func.func @transform_3(%arg0: i32) -> (i32, i32) {
    %c0_i32 = arith.constant 0 : i32
    %c0_i32_0 = arith.constant 0 : i32
    %c0_i32_1 = arith.constant 0 : i32
    return %c0_i32, %c0_i32_0 : i32, i32
  }
  func.func @transform_4(%arg0: i32) -> (i32, i32) {
    %c0_i32 = arith.constant 0 : i32
    %c0_i32_0 = arith.constant 0 : i32
    %c0_i32_1 = arith.constant 0 : i32
    return %c0_i32, %c0_i32_0 : i32, i32
  }
  func.func @transform_5(%arg0: i32) -> (i32, i32) {
    %c0_i32 = arith.constant 0 : i32
    %c0_i32_0 = arith.constant 0 : i32
    %c0_i32_1 = arith.constant 0 : i32
    return %c0_i32, %c0_i32_0 : i32, i32
  }
  func.func @transform_6(%arg0: i32) -> (i32, i32) {
    %c0_i32 = arith.constant 0 : i32
    %c0_i32_0 = arith.constant 0 : i32
    %c0_i32_1 = arith.constant 0 : i32
    return %c0_i32, %c0_i32_0 : i32, i32
  }
  func.func @transform_7(%arg0: i32) -> (i32, i32) {
    %c0_i32 = arith.constant 0 : i32
    %c0_i32_0 = arith.constant 0 : i32
    %c0_i32_1 = arith.constant 0 : i32
    return %c0_i32, %c0_i32_0 : i32, i32
  }
  func.func @transform_8(%arg0: i32) -> (i32, i32) {
    %c0_i32 = arith.constant 0 : i32
    %c0_i32_0 = arith.constant 0 : i32
    return %arg0, %c0_i32 : i32, i32
  }
}

</mosaic_0001>

<bundles_post_ra>
// kernel: tpu_custom_call.1
= control target key start
LH: loop header
LB: loop body
LE: loop exit
PB: predicated region body
PF: predicated region fallthrough
CT: control target
= control target key end

     0   :  { %13 = vsyncpa [#allocation3], 0  ;;  %s2683_s0 = inlined_call_operand.vmem [shape: s32[128,1], index: 0, kind: input, shape index: {}]   ;;  %s2684_s1 = inlined_call_operand.vmem [shape: bf16[64,32], index: 1, kind: input, shape index: {}]   ;;  %s2685_s2 = inlined_call_operand.vmem [shape: bf16[256,32], index: 2, kind: input, shape index: {}]   ;;  %s2686_s3 = inlined_call_operand.vmem [shape: bf16[256,32], index: 3, kind: input, shape index: {}]   ;;  %s2687_s4 = inlined_call_operand.vmem [shape: bf16[32,32], index: 4, kind: input, shape index: {}]   ;;  %s2688_s5 = inlined_call_operand.vmem [shape: f32[1,32], index: 5, kind: input, shape index: {}]   ;;  %s2689_s6 = inlined_call_operand.vmem [shape: f32[1,32], index: 6, kind: input, shape index: {}]   ;;  %s2690_s7 = inlined_call_operand.vmem [shape: f32[8,32], index: 7, kind: input, shape index: {}]   ;;  %s2691_s8 = inlined_call_operand.hbm [shape: f32[16,32], index: 8, kind: output, shape index: {}]  }
   0x1   :  { %15 = vsyncpa [#allocation3 + $0x1], 0  ;;  %s2083_s27 = smov 0   ;;  %s2085_s28 = smov 0  }
   0x2   :  { %s2087_s29 = smov 0   ;;  %s2089_s30 = smov 0  }
   0x3 LB: > { %s2104_s9 = sadd.s32 4294967295, %s2029_s30   ;;  %s1591_s10 = sadd.s32 4294967294, %s2029_s30   ;;  %s2029_s30 = sphi %s2089_s30, %s2697_s30   ;;  %s2025_s29 = sphi %s2087_s29, %s2696_s29   ;;  %s2021_s28 = sphi %s2085_s28, %s2695_s28   ;;  %s2017_s27 = sphi %s2083_s27, %s2694_s27  }
   0x4   : > { %s2108_s11 = sadd.s32 1, %s2029_s30   ;;  %s201_s12 = sadd.s32 1, %s2025_s29 }
   0x5   : > { %s198_s13 = ssub.s32 %s2029_s30, %s2108_s11  ;;  %p211_p0 = scmp.ne.s32.totalorder %s2025_s29, %s2021_s28 }
   0x6   : > { %p199_p1 = scmp.eq.s32.totalorder %s198_s13, 0  ;;  %p212_p2 = scmp.eq.s32.totalorder %s2104_s9, 1 }
   0x7   : > { %p217_p3 = scmp.ne.s32.totalorder %s2021_s28, %s2017_s27  ;;  %p218_p4 = scmp.eq.s32.totalorder %s1591_s10, 1 }
   0x8   : > { %s2119_s14 = scalar_select %p199_p1, %s2025_s29, %s201_s12  }
   0x9   : > { %p2121_p5 = por %p212_p2, %p211_p0  ;;  %p2125_p6 = por %p218_p4, %p217_p3 }
   0xa   : > { %p1594_p7 = scmp.ge.s32.totalorder %s2029_s30, 1  ;;  %p266_p8 = scmp.lt.s32.totalorder %s2029_s30, 3 }
   0xc   : > { %p267_p9 = pnand %p1594_p7, %p266_p8 }
   0xd   : > { %s1596_s17 = sshll.u32 (!%p267_p9), %s2104_s9, 3  ;;  %v2031_v0 = vmov (!%p267_p9), 0   ;;  %v1929_v1 = vld [vmem:[%s2684_s1] sm:$0xff] (!%p267_p9)   ;;  %v1930_v2 = vld [vmem:[%s2684_s1 + $0x8] sm:$0xff] (!%p267_p9)   ;;  %v1931_v7 = vld [vmem:[%s2684_s1 + $0x10] sm:$0xff] (!%p267_p9)   ;;  %v315_v13 = vlaneseq (!%p267_p9)  ;;  %vm393_vm4 = vcmask (!%p267_p9), 523264  }
   0xe   : > { %270 = sbr.rel (%p267_p9) target bundleno = 1033 (0x409), region = 52  ;;  %1808 = vset.pattern.permute.xlu1 (!%p267_p9), %v2031_v0  ;;  %1807 = vset.pattern.permute.xlu0 (!%p267_p9), %v2031_v0  ;;  %p301_p10 = scmp.lt.s32.totalorder (!%p267_p9), %s1596_s17, 15  ;;  %v1932_v10 = vld [vmem:[%s2684_s1 + $0x18] sm:$0xff] (!%p267_p9)   ;;  %v2032_v19 = vmov (!%p267_p9), 0.0   ;;  %v1933_v36 = vld [vmem:[%s2685_s2 + $0x40] sm:$0xff] (!%p267_p9)   ;;  %v1937_v40 = vld [vmem:[%s2685_s2 + $0x48] sm:$0xff] (!%p267_p9)  }
   0xf   : > { %1738 = vmatprep.subr.bf16.mxu0 (!%p267_p9), %v1929_v1  ;;  %v316_v14 = vand.u32 (!%p267_p9), 127, %v315_v13  ;;  %v1934_v37 = vld [vmem:[%s2686_s3 + $0x40] sm:$0xff] (!%p267_p9)   ;;  %v1938_v41 = vld [vmem:[%s2686_s3 + $0x48] sm:$0xff] (!%p267_p9)   ;;  %1655 = vmatprep.subr.bf16.mxu1 (!%p267_p9), %v1933_v36  ;;  %v1941_v44 = vld [vmem:[%s2685_s2 + $0x50] sm:$0xff] (!%p267_p9)   ;;  %vm632_vm9 = vcmask (!%p267_p9), 1042432   ;;  %vm480_vm10 = vcmask (!%p267_p9), 1046528  }
  0x10   : > { %1739 = vmatpush3.bf16.msra.mxu0 (!%p267_p9), %v1929_v1  ;;  %v1935_v38 = vld [vmem:[%s2685_s2] sm:$0xff] (!%p267_p9)   ;;  %v1939_v42 = vld [vmem:[%s2685_s2 + $0x8] sm:$0xff] (!%p267_p9)   ;;  %v1942_v45 = vld [vmem:[%s2686_s3 + $0x50] sm:$0xff] (!%p267_p9)   ;;  %vm674_vm11 = vcmask (!%p267_p9), 1041408   ;;  %vm522_vm12 = vcmask (!%p267_p9), 1045504   ;;  %vm716_vm13 = vcmask (!%p267_p9), 1040384  }
  0x11   : > { %1740 = vmatprep.subr.bf16.mxu0 (!%p267_p9), %v1930_v2  ;;  %v1936_v39 = vld [vmem:[%s2686_s3] sm:$0xff] (!%p267_p9)   ;;  %1656 = vmatpush3.bf16.msra.mxu1 (!%p267_p9), %v1935_v38  ;;  %v1940_v43 = vld [vmem:[%s2686_s3 + $0x8] sm:$0xff] (!%p267_p9)   ;;  %v1943_v46 = vld [vmem:[%s2685_s2 + $0x10] sm:$0xff] (!%p267_p9)   ;;  %vm564_vm14 = vcmask (!%p267_p9), 1044480   ;;  %v2230_v59 = vrot.slane (!%p267_p9), %v2032_v19, 5  ;;  %v2233_v60 = vrot.slane (!%p267_p9), %v2032_v19, 1 }
  0x12   : > { %1657 = vmatprep.subr.bf16.mxu1 (!%p267_p9), %v1937_v40  ;;  %v1944_v47 = vld [vmem:[%s2686_s3 + $0x10] sm:$0xff] (!%p267_p9)   ;;  %v1945_v48 = vld [vmem:[%s2685_s2 + $0x58] sm:$0xff] (!%p267_p9)   ;;  %v1949_v52 = vld [vmem:[%s2685_s2 + $0x60] sm:$0xff] (!%p267_p9)   ;;  %v2241_v63 = vrot.slane (!%p267_p9), %v2032_v19, 6  ;;  %v2244_v0 = vrot.slane (!%p267_p9), %v2032_v19, 2  ;;  %v2247_v1 = vrot.slane (!%p267_p9), %v2032_v19, 7 }
  0x13   : > { %v1946_v49 = vld [vmem:[%s2686_s3 + $0x58] sm:$0xff] (!%p267_p9)   ;;  %v1950_v53 = vld [vmem:[%s2686_s3 + $0x60] sm:$0xff] (!%p267_p9)   ;;  %v1953_v56 = vld [vmem:[%s2685_s2 + $0x68] sm:$0xff] (!%p267_p9)   ;;  %s2033_s13 = smov (!%p267_p9), 32   ;;  %s2035_s18 = smov (!%p267_p9), 96   ;;  %vm606_vm15 = vcmask (!%p267_p9), 1043456  }
  0x14   : > { %1741 = vmatpush3.bf16.msra.mxu0 (!%p267_p9), %v1930_v2  ;;  %v1947_v50 = vld [vmem:[%s2685_s2 + $0x18] sm:$0xff] (!%p267_p9)   ;;  %v1951_v54 = vld [vmem:[%s2685_s2 + $0x20] sm:$0xff] (!%p267_p9)   ;;  %v1954_v57 = vld [vmem:[%s2686_s3 + $0x68] sm:$0xff] (!%p267_p9)   ;;  %v2250_v2 = vrot.slane (!%p267_p9), %v2032_v19, 3 }
  0x15   : > { %s2699_s17 = smov (!%p301_p10, %s1596_s17), 15  ;;  %1742 = vmatprep.subr.bf16.mxu0 %v1931_v7  ;;  %1658 = vmatpush3.bf16.msra.mxu1 %v1939_v42  ;;  %v1948_v51 = vld [vmem:[%s2686_s3 + $0x18] sm:$0xff]   ;;  %v1952_v55 = vld [vmem:[%s2686_s3 + $0x20] sm:$0xff]   ;;  %v1955_v58 = vld [vmem:[%s2685_s2 + $0x28] sm:$0xff]  }
  0x16   : > { %s1597_s22 = sshll.u32 %s2699_s17, 3  ;;  %1659 = vmatprep.subr.bf16.mxu1 %v1941_v44  ;;  %v1956_v61 = vld [vmem:[%s2686_s3 + $0x28] sm:$0xff]   ;;  %v1963_v38 = vld [vmem:[%s2685_s2 + $0x38] sm:$0xff]   ;;  %s2034_s17 = smov 64  }
  0x17   : > { %s304_s25 = scalar_lea.vmem %s2683_s0, %s1597_s22 }
  0x18   : > { %v309_v3 = vld [vmem:[%s304_s25 + $0x10] sm:$0xff]  ;;  %v307_v4 = vld [vmem:[%s304_s25] sm:$0xff]  ;;  %v310_v5 = vld [vmem:[%s304_s25 + $0x18] sm:$0xff]  ;;  %1743 = vmatpush3.bf16.msra.mxu0 %v1931_v7 }
  0x19   : > { %324 = vperm.xlu1 %1808, %v309_v3   ;;  %318 = vperm.xlu0 %1807, %v307_v4   ;;  %v308_v6 = vld [vmem:[%s304_s25 + $0x8] sm:$0xff]  ;;  %v311_v9 = vld [vmem:[%s304_s25 + $0x20] sm:$0xff]  ;;  %v314_v11 = vld [vmem:[%s304_s25 + $0x38] sm:$0xff] }
  0x1a   : > { %v312_v8 = vld [vmem:[%s304_s25 + $0x28] sm:$0xff]  ;;  %1744 = vmatprep.subr.bf16.mxu0 %v1932_v10  ;;  %v313_v12 = vld [vmem:[%s304_s25 + $0x30] sm:$0xff]  ;;  %1660 = vmatpush3.bf16.msra.mxu1 %v1943_v46  ;;  %s2037_s25 = smov [#allocation2]  }
  0x1b   : > { %1661 = vmatprep.subr.bf16.mxu1 %v1945_v48  ;;  %s1971_s26 = sshll.u32 %s2037_s25, 4  ;;  %s1972_s26 = int_to_ptr.vmem [resolvable:$false] %s1971_s26 }
  0x1c   : > { %1745 = vmatpush3.bf16.msra.mxu0 %v1932_v10  ;;  %s1973_s10 = scalar_lea.vmem %s1972_s26, 256 }
  0x1d   : > { %327 = vperm.xlu1 %1808, %v310_v5   ;;  %321 = vperm.xlu0 %1807, %v308_v6  }
  0x1e   : > { %1695 = vmatprep.subr.bf16.mxu0 %v1934_v37  ;;  %1662 = vmatpush3.bf16.msra.mxu1 %v1947_v50  ;;  %v1962_v37 = vld [vmem:[%s2686_s3 + $0x78] sm:$0xff]  }
  0x1f   : > { %1663 = vmatprep.subr.bf16.mxu1 %v1949_v52 }
  0x21   : > { %333 = vperm.xlu1 %1808, %v312_v8   ;;  %330 = vperm.xlu0 %1807, %v311_v9  }
  0x22   : > { %1664 = vmatpush3.bf16.msra.mxu1 %v1951_v54 }
  0x23   : > { %1665 = vmatprep.subr.bf16.mxu1 %v1953_v56 }
  0x25   : > { %339 = vperm.xlu1 %1808, %v314_v11   ;;  %336 = vperm.xlu0 %1807, %v313_v12  }
  0x26   : > { %1666 = vmatpush3.bf16.msra.mxu1 %v1955_v58 }
  0x98   : > { %v325_v15 = vpop.permute.xlu1 %324  ;;  %v319_v16 = vpop.permute.xlu0 %318 }
  0x99   : > { %vm343_vm0 = vcmp.eq.s32.totalorder %v316_v14, %v325_v15  ;;  %vm341_vm1 = vcmp.eq.s32.totalorder %v316_v14, %v319_v16 }
  0x9a   : > { %v351_v20 = vsel %vm343_vm0, 1.0, %v2032_v19  ;;  %v349_v21 = vsel %vm341_vm1, 1.0, %v2032_v19  ;;  %vm758_vm0 = vcmask 261120   ;;  %vm775_vm1 = vcmask 785408  }
  0x9c   : > { %v328_v17 = vpop.permute.xlu1 %327  ;;  %v322_v18 = vpop.permute.xlu0 %321 }
  0x9d   : > { %vm344_vm2 = vcmp.eq.s32.totalorder %v316_v14, %v328_v17  ;;  %vm342_vm3 = vcmp.eq.s32.totalorder %v316_v14, %v322_v18 }
  0x9e   : > { %v352_v22 = vsel %vm344_vm2, 1.0, %v2032_v19  ;;  %v350_v23 = vsel %vm342_vm3, 1.0, %v2032_v19  ;;  %vm2036_vm2 = vmmov 0   ;;  %vm1377_vm3 = vcmask 1041409  }
  0x9f   : > { %v358_v24 = vpack.c.bf16 %v352_v22, %v351_v20  ;;  %v357_v25 = vpack.c.bf16 %v350_v23, %v349_v21  ;;  %v1958_v21 = vld [vmem:[%s2686_s3 + $0x70] sm:$0xff]  }
  0xa0   : > { %v334_v26 = vpop.permute.xlu1 %333  ;;  %v331_v27 = vpop.permute.xlu0 %330 }
  0xa1   : > { %vm346_vm5 = vcmp.eq.s32.totalorder %v316_v14, %v334_v26  ;;  %vm345_vm6 = vcmp.eq.s32.totalorder %v316_v14, %v331_v27  ;;  %1746 = vmatprep.mubr.msk.bf16.mxu0 %vm393_vm4, %v357_v25  ;;  %v1959_v26 = vld [vmem:[%s2685_s2 + $0x30] sm:$0xff]  }
  0xa2   : > { %v354_v28 = vsel %vm346_vm5, 1.0, %v2032_v19  ;;  %v353_v29 = vsel %vm345_vm6, 1.0, %v2032_v19  ;;  %1747 = vmatmul.mubr.msk.bf16.vlgmr.msra.gmra.mrb[0].mxu0 %vm393_vm4, %v358_v24  ;;  %v1960_v27 = vld [vmem:[%s2686_s3 + $0x30] sm:$0xff]   ;;  %vm1381_vm5 = vcmask 1043459   ;;  %vm1383_vm6 = vcmask 1044484  }
  0xa3   : > { %v359_v30 = vpack.c.bf16 %v354_v28, %v353_v29  ;;  %1696 = vmatpush3.bf16.msra.mxu0 %v1936_v39 }
  0xa4   : > { %v340_v31 = vpop.permute.xlu1 %339  ;;  %v337_v32 = vpop.permute.xlu0 %336  ;;  %1697 = vmatprep.subr.bf16.mxu0 %v1938_v41 }
  0xa5   : > { %vm348_vm7 = vcmp.eq.s32.totalorder %v316_v14, %v340_v31  ;;  %vm347_vm8 = vcmp.eq.s32.totalorder %v316_v14, %v337_v32  ;;  %1750 = vmatprep.mubr.msk.bf16.mxu0 %vm393_vm4, %v359_v30  ;;  %v1957_v14 = vld [vmem:[%s2685_s2 + $0x70] sm:$0xff]   ;;  %v1961_v32 = vld [vmem:[%s2685_s2 + $0x78] sm:$0xff]  }
  0xa6   : > { %v356_v33 = vsel %vm348_vm7, 1.0, %v2032_v19  ;;  %v355_v34 = vsel %vm347_vm8, 1.0, %v2032_v19  ;;  %1667 = vmatprep.subr.bf16.mxu1 %v1957_v14  ;;  %vm1385_vm7 = vcmask 1045509   ;;  %vm1387_vm8 = vcmask 1046534  }
  0xa7   : > { %v360_v35 = vpack.c.bf16 %v356_v33, %v355_v34  ;;  %1698 = vmatpush3.bf16.msra.mxu0 %v1940_v43  ;;  %1668 = vmatpush3.bf16.msra.mxu1 %v1959_v26  ;;  %v1964_v43 = vld [vmem:[%s2686_s3 + $0x38] sm:$0xff]  }
  0xa8   : > { %1699 = vmatprep.subr.bf16.mxu0 %v1942_v45  ;;  %1669 = vmatprep.subr.bf16.mxu1 %v1961_v32 }
  0xaa   : > { %1751 = vmatmul.mubr.msk.bf16.gmra.mrb[4].mxu0 %vm393_vm4, %v360_v35 }
  0xab   : > { %1700 = vmatpush3.bf16.msra.mxu0 %v1944_v47  ;;  %1670 = vmatpush3.bf16.msra.mxu1 %v1963_v38 }
  0xac   : > { %1701 = vmatprep.subr.bf16.mxu0 %v1946_v49  ;;  %1754 = vmatprep.subr.bf16.mxu1 %v2032_v19 }
  0xaf   : > { %1702 = vmatpush3.bf16.msra.mxu0 %v1948_v51 }
  0xb0   : > { %1703 = vmatprep.subr.bf16.mxu0 %v1950_v53 }
  0xb3   : > { %1704 = vmatpush3.bf16.msra.mxu0 %v1952_v55 }
  0xb4   : > { %1705 = vmatprep.subr.bf16.mxu0 %v1954_v57 }
  0xb7   : > { %1706 = vmatpush3.bf16.msra.mxu0 %v1956_v61 }
  0xb8   : > { %1707 = vmatprep.subr.bf16.mxu0 %v1958_v21 }
  0xbb   : > { %1708 = vmatpush3.bf16.msra.mxu0 %v1960_v27 }
  0xbc   : > { %1709 = vmatprep.subr.bf16.mxu0 %v1962_v37 }
  0xbf   : > { %1710 = vmatpush3.bf16.msra.mxu0 %v1964_v43 }
 0x175   : > { %v2238_v62 = vpop.f32.mrb[0].mxu0 }
 0x176   : > { %v2252_v3 = vpop.f32.mrb[1].mxu0  ;;  %v636_v4 = vrot.slane %v2238_v62, 5  ;;  %v484_v5 = vrot.slane %v2238_v62, 1  ;;  %v678_v6 = vrot.slane %v2238_v62, 6  ;;  %v526_v7 = vrot.slane %v2238_v62, 2 }
 0x177   : > { %v2258_v8 = vpop.f32.mrb[2].mxu0  ;;  %v633_v9 = vrot.slane %v2252_v3, 5  ;;  %v481_v10 = vrot.slane %v2252_v3, 1  ;;  %v675_v11 = vrot.slane %v2252_v3, 6  ;;  %v523_v12 = vrot.slane %v2252_v3, 2 }
 0x178   : > { %v2267_v15 = vpop.f32.mrb[3].mxu0  ;;  %v717_v16 = vrot.slane %v2252_v3, 7  ;;  %v720_v17 = vrot.slane %v2238_v62, 7  ;;  %v565_v18 = vrot.slane %v2252_v3, 3  ;;  %v568_v20 = vrot.slane %v2238_v62, 3 }
 0x179   : > { %v634_v22 = vrot.slane %v2267_v15, 5  ;;  %v482_v23 = vrot.slane %v2267_v15, 1  ;;  %v676_v24 = vrot.slane %v2267_v15, 6  ;;  %v524_v25 = vrot.slane %v2267_v15, 2 }
 0x17a   : > { %v718_v28 = vrot.slane %v2267_v15, 7  ;;  %v566_v29 = vrot.slane %v2267_v15, 3  ;;  %v638_v30 = vrot.slane %v2258_v8, 5  ;;  %v486_v31 = vrot.slane %v2258_v8, 1 }
 0x17b   : > { %v635_v33 = vsel %vm632_vm9, %v633_v9, %v634_v22  ;;  %v637_v34 = vsel %vm632_vm9, %v634_v22, %v636_v4  ;;  %v483_v35 = vsel %vm480_vm10, %v481_v10, %v482_v23  ;;  %v485_v36 = vsel %vm480_vm10, %v482_v23, %v484_v5 }
 0x17c   : > { %v1809_v39 = vpack.i.bf16 %v637_v34, %v635_v33  ;;  %v1814_v40 = vpack.i.bf16 %v485_v36, %v483_v35  ;;  %v677_v41 = vsel %vm674_vm11, %v675_v11, %v676_v24  ;;  %v679_v42 = vsel %vm674_vm11, %v676_v24, %v678_v6 }
 0x17d   : > { %v2312_v44 = vpop.f32.mrb[4].mxu0  ;;  %v1819_v45 = vpack.i.bf16 %v679_v42, %v677_v41  ;;  %v525_v46 = vsel %vm522_vm12, %v523_v12, %v524_v25  ;;  %v527_v47 = vsel %vm522_vm12, %v524_v25, %v526_v7  ;;  %v719_v48 = vsel %vm716_vm13, %v717_v16, %v718_v28 }
 0x17e   : > { %1810 = vrot.lane.b32.xlu0 %v1809_v39, %s2033_s13  ;;  %1815 = vrot.lane.b32.xlu1 %v1814_v40, %s2033_s13  ;;  %v2321_v49 = vpop.f32.mrb[5].mxu0  ;;  %v1824_v50 = vpack.i.bf16 %v527_v47, %v525_v46  ;;  %v721_v51 = vsel %vm716_vm13, %v718_v28, %v720_v17  ;;  %v567_v52 = vsel %vm564_vm14, %v565_v18, %v566_v29  ;;  %v680_v53 = vrot.slane %v2258_v8, 6 }
 0x17f   : > { %v2328_v54 = vpop.f32.mrb[6].mxu0  ;;  %v1829_v55 = vpack.i.bf16 %v721_v51, %v719_v48  ;;  %v569_v56 = vsel %vm564_vm14, %v566_v29, %v568_v20  ;;  %v639_v57 = vsel %vm632_vm9, %v636_v4, %v638_v30  ;;  %v640_v58 = vrot.slane %v2321_v49, 5 }
 0x180   : > { %v2335_v61 = vpop.f32.mrb[7].mxu0  ;;  %v1834_v9 = vpack.i.bf16 %v569_v56, %v567_v52  ;;  %v487_v10 = vsel %vm480_vm10, %v484_v5, %v486_v31  ;;  %v488_v11 = vrot.slane %v2321_v49, 1  ;;  %v2344_v12 = vsel %vm674_vm11, %v678_v6, %v680_v53 }
 0x181   : > { %v641_v4 = vsel %vm632_vm9, %v638_v30, %v640_v58  ;;  %v682_v14 = vrot.slane %v2321_v49, 6  ;;  %v528_v16 = vrot.slane %v2258_v8, 2  ;;  %v530_v18 = vrot.slane %v2321_v49, 2 }
 0x182   : > { %1820 = vrot.lane.b32.xlu0 %v1819_v45, %s2034_s17  ;;  %1825 = vrot.lane.b32.xlu1 %v1824_v50, %s2034_s17  ;;  %v1839_v5 = vpack.i.bf16 %v641_v4, %v639_v57  ;;  %v489_v6 = vsel %vm480_vm10, %v486_v31, %v488_v11  ;;  %v722_v21 = vrot.slane %v2258_v8, 7  ;;  %v724_v22 = vrot.slane %v2321_v49, 7 }
 0x183   : > { %v1844_v23 = vpack.i.bf16 %v489_v6, %v487_v10  ;;  %v683_v24 = vsel %vm674_vm11, %v680_v53, %v682_v14  ;;  %v529_v25 = vsel %vm522_vm12, %v526_v7, %v528_v16  ;;  %v531_v26 = vsel %vm522_vm12, %v528_v16, %v530_v18 }
 0x184   : > { %v1849_v27 = vpack.i.bf16 %v683_v24, %v2344_v12  ;;  %v1854_v28 = vpack.i.bf16 %v531_v26, %v529_v25  ;;  %v2365_v29 = vsel %vm716_vm13, %v720_v17, %v722_v21  ;;  %v725_v30 = vsel %vm716_vm13, %v722_v21, %v724_v22 }
 0x185   : > { %v1859_v31 = vpack.i.bf16 %v725_v30, %v2365_v29  ;;  %v570_v32 = vrot.slane %v2258_v8, 3  ;;  %v572_v33 = vrot.slane %v2321_v49, 3  ;;  %v644_v7 = vrot.slane %v2312_v44, 5 }
 0x186   : > { %1830 = vrot.lane.b32.xlu0 %v1829_v55, %s2035_s18  ;;  %1835 = vrot.lane.b32.xlu1 %v1834_v9, %s2035_s18  ;;  %v646_v34 = vrot.slane %v2328_v54, 5  ;;  %v492_v17 = vrot.slane %v2312_v44, 1  ;;  %v494_v35 = vrot.slane %v2328_v54, 1  ;;  %v642_v36 = vrot.slane %v2335_v61, 5 }
 0x187   : > { %v571_v37 = vsel %vm564_vm14, %v568_v20, %v570_v32  ;;  %v573_v38 = vsel %vm564_vm14, %v570_v32, %v572_v33  ;;  %v490_v39 = vrot.slane %v2335_v61, 1  ;;  %v684_v40 = vrot.slane %v2335_v61, 6 }
 0x188   : > { %v1864_v41 = vpack.i.bf16 %v573_v38, %v571_v37  ;;  %v647_v42 = vsel %vm632_vm9, %v644_v7, %v646_v34  ;;  %v649_v43 = vsel %vm632_vm9, %v646_v34, %v2230_v59  ;;  %v495_v45 = vsel %vm480_vm10, %v492_v17, %v494_v35 }
 0x189   : > { %v1869_v46 = vpack.i.bf16 %v649_v43, %v647_v42  ;;  %v497_v47 = vsel %vm480_vm10, %v494_v35, %v2233_v60  ;;  %v2391_v20 = vsel %vm632_vm9, %v640_v58, %v642_v36  ;;  %v2394_v48 = vsel %vm632_vm9, %v642_v36, %v644_v7 }
 0x18a   : > { %1840 = vrot.lane.b32.xlu0 %v1839_v5, %s2033_s13  ;;  %1845 = vrot.lane.b32.xlu1 %v1844_v23, %s2033_s13  ;;  %v1874_v50 = vpack.i.bf16 %v497_v47, %v495_v45  ;;  %v1879_v59 = vpack.i.bf16 %v2394_v48, %v2391_v20  ;;  %v491_v51 = vsel %vm480_vm10, %v488_v11, %v490_v39  ;;  %v686_v52 = vrot.slane %v2312_v44, 6 }
 0x18b   : > { %v493_v60 = vsel %vm480_vm10, %v490_v39, %v492_v17  ;;  %v685_v53 = vsel %vm674_vm11, %v682_v14, %v684_v40  ;;  %v532_v55 = vrot.slane %v2335_v61, 2  ;;  %v534_v56 = vrot.slane %v2312_v44, 2 }
 0x18c   : > { %v1884_v57 = vpack.i.bf16 %v493_v60, %v491_v51  ;;  %v687_v58 = vsel %vm674_vm11, %v684_v40, %v686_v52  ;;  %v726_v9 = vrot.slane %v2335_v61, 7  ;;  %v728_v10 = vrot.slane %v2312_v44, 7 }
 0x18d   : > { %v1889_v12 = vpack.i.bf16 %v687_v58, %v685_v53  ;;  %v533_v11 = vsel %vm522_vm12, %v530_v18, %v532_v55  ;;  %v535_v4 = vsel %vm522_vm12, %v532_v55, %v534_v56  ;;  %v574_v16 = vrot.slane %v2335_v61, 3 }
 0x18e   : > { %1850 = vrot.lane.b32.xlu0 %v1849_v27, %s2034_s17  ;;  %1855 = vrot.lane.b32.xlu1 %v1854_v28, %s2034_s17  ;;  %v1894_v14 = vpack.i.bf16 %v535_v4, %v533_v11  ;;  %v727_v5 = vsel %vm716_vm13, %v724_v22, %v726_v9  ;;  %v729_v6 = vsel %vm716_vm13, %v726_v9, %v728_v10  ;;  %v576_v21 = vrot.slane %v2312_v44, 3 }
 0x18f   : > { %v1899_v23 = vpack.i.bf16 %v729_v6, %v727_v5  ;;  %v575_v24 = vsel %vm564_vm14, %v572_v33, %v574_v16  ;;  %v688_v18 = vrot.slane %v2328_v54, 6  ;;  %v536_v25 = vrot.slane %v2328_v54, 2 }
 0x190   : > { %v577_v26 = vsel %vm564_vm14, %v574_v16, %v576_v21  ;;  %v730_v27 = vrot.slane %v2328_v54, 7  ;;  %v578_v28 = vrot.slane %v2328_v54, 3  ;;  %v607_v29 = vrot.slane %v2252_v3, 4 }
 0x191   : > { %v1909_v22 = vpack.i.bf16 %v577_v26, %v575_v24  ;;  %v689_v30 = vsel %vm674_vm11, %v686_v52, %v688_v18  ;;  %v691_v32 = vsel %vm674_vm11, %v688_v18, %v2241_v63  ;;  %v537_v33 = vsel %vm522_vm12, %v534_v56, %v536_v25 }
 0x192   : > { %1860 = vrot.lane.b32.xlu0 %v1859_v31, %s2035_s18  ;;  %1865 = vrot.lane.b32.xlu1 %v1864_v41, %s2035_s18  ;;  %v1904_v7 = vpack.i.bf16 %v691_v32, %v689_v30  ;;  %v539_v34 = vsel %vm522_vm12, %v536_v25, %v2244_v0  ;;  %v731_v17 = vsel %vm716_vm13, %v728_v10, %v730_v27  ;;  %v608_v35 = vrot.slane %v2267_v15, 4 }
 0x193   : > { %v1914_v36 = vpack.i.bf16 %v539_v34, %v537_v33  ;;  %v733_v37 = vsel %vm716_vm13, %v730_v27, %v2247_v1  ;;  %v579_v63 = vsel %vm564_vm14, %v576_v21, %v578_v28  ;;  %v581_v38 = vsel %vm564_vm14, %v578_v28, %v2250_v2 }
 0x194   : > { %v1919_v31 = vpack.i.bf16 %v733_v37, %v731_v17  ;;  %v1924_v39 = vpack.i.bf16 %v581_v38, %v579_v63  ;;  %v609_v40 = vsel %vm606_vm15, %v607_v29, %v608_v35  ;;  %v610_v41 = vrot.slane %v2238_v62, 4 }
 0x195   : > { %v612_v0 = vrot.slane %v2258_v8, 4  ;;  %v614_v42 = vrot.slane %v2321_v49, 4  ;;  %v618_v43 = vrot.slane %v2312_v44, 4  ;;  %v620_v2 = vrot.slane %v2328_v54, 4 }
 0x196   : > { %1870 = vrot.lane.b32.xlu0 %v1869_v46, %s2033_s13  ;;  %1875 = vrot.lane.b32.xlu1 %v1874_v50, %s2033_s13  ;;  %v611_v1 = vsel %vm606_vm15, %v608_v35, %v610_v41  ;;  %v616_v45 = vrot.slane %v2335_v61, 4  ;;  %vm1389_vm9 = vcmask 1047559  }
 0x197   : > { %v2450_v47 = vsel %vm606_vm15, %v610_v41, %v612_v0  ;;  %v2453_v20 = vsel %vm606_vm15, %v612_v0, %v614_v42  ;;  %v2458_v46 = vsel %vm606_vm15, %v618_v43, %v620_v2 }
 0x198   : > { %v2461_v48 = vsel %vm606_vm15, %v614_v42, %v616_v45  ;;  %v2464_v50 = vsel %vm606_vm15, %v616_v45, %v618_v43 }
 0x19a   : > { %1880 = vrot.lane.b32.xlu0 %v1879_v59, %s2033_s13  ;;  %1885 = vrot.lane.b32.xlu1 %v1884_v57, %s2033_s13  ;;  %s297_s13 = sand.u32 1, %s2021_s28  }
 0x19e   : > { %1890 = vrot.lane.b32.xlu0 %v1889_v12, %s2034_s17  ;;  %1895 = vrot.lane.b32.xlu1 %v1894_v14, %s2034_s17 }
 0x1a2   : > { %1900 = vrot.lane.b32.xlu0 %v1899_v23, %s2035_s18  ;;  %1910 = vrot.lane.b32.xlu1 %v1909_v22, %s2035_s18 }
 0x1a6   : > { %1905 = vrot.lane.b32.xlu0 %v1904_v7, %s2034_s17  ;;  %1915 = vrot.lane.b32.xlu1 %v1914_v36, %s2034_s17  ;;  %s2624_s17 = sshll.u32 %s297_s13, 3 }
 0x1a7   : > { %s299_s19 = scalar_lea.vmem [#allocation2], %s2624_s17 }
 0x1a8   : > { %s1532_s20 = sshll.u32 %s299_s19, 4  ;;  %s2639_s20 = int_to_ptr.vmem [resolvable:$true] %s1532_s20 }
 0x1a9   : > { %s1967_s24 = scalar_lea.vmem %s2639_s20, 128  ;;  %p1974_p0 = scmp.lt.s32.totalorder %s2639_s20, %s1972_s26 }
 0x1aa   : > { %1920 = vrot.lane.b32.xlu0 %v1919_v31, %s2035_s18  ;;  %1925 = vrot.lane.b32.xlu1 %v1924_v39, %s2035_s18  ;;  %s1644_s18 = sshll.u32 %s2104_s9, 7  ;;  %s1519_s9 = scalar_lea.sflag [#allocation3], %s297_s13 }
 0x1ab   : > { %s2637_s23 = scalar_lea.hbm %s2691_s8, %s1644_s18  ;;  %p1968_p11 = scmp.ne.s32.totalorder %s2639_s20, %s1967_s24 }
 0x1ac   : > { %p1975_p1 = scmp.lt.s32.totalorder %s1973_s10, %s1967_s24 }
 0x1ad   : > { %p1969_p12 = pnand %p1968_p11, %p2121_p5 }
 0x1ae   : > { %p1976_p2 = por %p1975_p1, %p1974_p0 }
 0x1af   : > { %p1970_p13 = pneg %p1969_p12 }
 0x1b1   : > { %p1977_p3 = pnand %p1976_p2, %p1970_p13 }
 0x1f0   : > { %v1816_v51 = vpop.permute.xlu1 %1815  ;;  %v1811_v59 = vpop.permute.xlu0 %1810 }
 0x1f1   : > { %v1818_v52 = vunpack.i.h.bf16 %v1816_v51  ;;  %v1817_v60 = vunpack.i.l.bf16 %v1816_v51  ;;  %v1813_v53 = vunpack.i.h.bf16 %v1811_v59  ;;  %v1812_v55 = vunpack.i.l.bf16 %v1811_v59 }
 0x1f3   : > { %v760_v11 = vsel %vm758_vm0, %v2267_v15, %v1818_v52  ;;  %v759_v4 = vsel %vm758_vm0, %v2252_v3, %v1817_v60  ;;  %v785_v16 = vsel %vm758_vm0, %v611_v1, %v1813_v53  ;;  %v784_v14 = vsel %vm758_vm0, %v609_v40, %v1812_v55 }
 0x1f4   : > { %v1826_v56 = vpop.permute.xlu1 %1825  ;;  %v1821_v57 = vpop.permute.xlu0 %1820 }
 0x1f5   : > { %v1828_v58 = vunpack.i.h.bf16 %v1826_v56  ;;  %v1827_v9 = vunpack.i.l.bf16 %v1826_v56  ;;  %v1823_v10 = vunpack.i.h.bf16 %v1821_v57  ;;  %v1822_v12 = vunpack.i.l.bf16 %v1821_v57 }
 0x1f7   : > { %v767_v25 = vsel %vm393_vm4, %v759_v4, %v1827_v9  ;;  %v768_v26 = vsel %vm393_vm4, %v760_v11, %v1828_v58  ;;  %v792_v27 = vsel %vm393_vm4, %v784_v14, %v1822_v12  ;;  %v793_v15 = vsel %vm393_vm4, %v785_v16, %v1823_v10 }
 0x1f8   : > { %v1836_v5 = vpop.permute.xlu1 %1835  ;;  %v1831_v6 = vpop.permute.xlu0 %1830 }
 0x1f9   : > { %v1838_v21 = vunpack.i.h.bf16 %v1836_v5  ;;  %v1837_v23 = vunpack.i.l.bf16 %v1836_v5  ;;  %v1833_v24 = vunpack.i.h.bf16 %v1831_v6  ;;  %v1832_v18 = vunpack.i.l.bf16 %v1831_v6 }
 0x1fb   : > { %v800_v3 = vsel %vm775_vm1, %v792_v27, %v1832_v18  ;;  %v801_v28 = vsel %vm775_vm1, %v793_v15, %v1833_v24  ;;  %v776_v29 = vsel %vm775_vm1, %v767_v25, %v1837_v23  ;;  %v777_v22 = vsel %vm775_vm1, %v768_v26, %v1838_v21 }
 0x1fc   : > { %v1846_v30 = vpop.permute.xlu1 %1845  ;;  %v1841_v32 = vpop.permute.xlu0 %1840  ;;  %v809_v33 = vpack.c.bf16 %v801_v28, %v800_v3  ;;  %v808_v7 = vpack.c.bf16 %v777_v22, %v776_v29  ;;  %v622_v3 = vrot.slane %v2032_v19, 4 }
 0x1fd   : > { %v1848_v34 = vunpack.i.h.bf16 %v1846_v30  ;;  %v1847_v17 = vunpack.i.l.bf16 %v1846_v30  ;;  %v1843_v35 = vunpack.i.h.bf16 %v1841_v32  ;;  %v1842_v36 = vunpack.i.l.bf16 %v1841_v32 }
 0x1fe   : > { %983 = vmatprep.mubr.bf16.mxu1 %v809_v33  ;;  %1249 = vmatprep.mubr.bf16.mxu0 %v809_v33 }
 0x1ff   : > { %984 = vmatmul.mubr.bf16.vlgmr.msra.gmra.mrb[0].mxu1 %v808_v7  ;;  %1250 = vmatmul.mubr.bf16.vlgmr.msra.gmra.mrb[8].mxu0 %v808_v7  ;;  %v762_v41 = vsel %vm758_vm0, %v2258_v8, %v1848_v34  ;;  %v761_v0 = vsel %vm758_vm0, %v2238_v62, %v1847_v17  ;;  %v787_v42 = vsel %vm758_vm0, %v2453_v20, %v1843_v35 }
 0x200   : > { %v1856_v37 = vpop.permute.xlu1 %1855  ;;  %v1851_v63 = vpop.permute.xlu0 %1850  ;;  %v786_v1 = vsel %vm758_vm0, %v2450_v47, %v1842_v36 }
 0x201   : > { %v1858_v38 = vunpack.i.h.bf16 %v1856_v37  ;;  %v1857_v31 = vunpack.i.l.bf16 %v1856_v37  ;;  %v1853_v39 = vunpack.i.h.bf16 %v1851_v63  ;;  %v1852_v40 = vunpack.i.l.bf16 %v1851_v63 }
 0x203   : > { %v769_v53 = vsel %vm393_vm4, %v761_v0, %v1857_v31  ;;  %v770_v55 = vsel %vm393_vm4, %v762_v41, %v1858_v38  ;;  %v794_v8 = vsel %vm393_vm4, %v786_v1, %v1852_v40  ;;  %v795_v62 = vsel %vm393_vm4, %v787_v42, %v1853_v39 }
 0x204   : > { %v1866_v43 = vpop.permute.xlu1 %1865  ;;  %v1861_v45 = vpop.permute.xlu0 %1860 }
 0x205   : > { %v1868_v51 = vunpack.i.h.bf16 %v1866_v43  ;;  %v1867_v59 = vunpack.i.l.bf16 %v1866_v43  ;;  %v1863_v52 = vunpack.i.h.bf16 %v1861_v45  ;;  %v1862_v60 = vunpack.i.l.bf16 %v1861_v45 }
 0x207   : > { %v802_v56 = vsel %vm775_vm1, %v794_v8, %v1862_v60  ;;  %v803_v20 = vsel %vm775_vm1, %v795_v62, %v1863_v52  ;;  %v778_v47 = vsel %vm775_vm1, %v769_v53, %v1867_v59  ;;  %v779_v57 = vsel %vm775_vm1, %v770_v55, %v1868_v51 }
 0x208   : > { %v1876_v58 = vpop.permute.xlu1 %1875  ;;  %v1871_v9 = vpop.permute.xlu0 %1870  ;;  %v811_v10 = vpack.c.bf16 %v803_v20, %v802_v56  ;;  %v810_v12 = vpack.c.bf16 %v779_v57, %v778_v47  ;;  %v623_v59 = vsel %vm606_vm15, %v620_v2, %v622_v3 }
 0x209   : > { %v1878_v27 = vunpack.i.h.bf16 %v1876_v58  ;;  %v1877_v15 = vunpack.i.l.bf16 %v1876_v58  ;;  %v1873_v31 = vunpack.i.h.bf16 %v1871_v9  ;;  %v1872_v39 = vunpack.i.l.bf16 %v1871_v9 }
 0x20a   : > { %991 = vmatprep.mubr.bf16.mxu1 %v811_v10  ;;  %1257 = vmatprep.mubr.bf16.mxu0 %v811_v10 }
 0x20b   : > { %992 = vmatmul.mubr.bf16.gmra.mrb[4].mxu1 %v810_v12  ;;  %1258 = vmatmul.mubr.bf16.gmra.mrb[12].mxu0 %v810_v12  ;;  %v766_v52 = vsel %vm758_vm0, %v2328_v54, %v1878_v27  ;;  %v765_v60 = vsel %vm758_vm0, %v2312_v44, %v1877_v15  ;;  %v791_v53 = vsel %vm758_vm0, %v623_v59, %v1873_v31 }
 0x20c   : > { %v1886_v11 = vpop.permute.xlu1 %1885  ;;  %v1881_v4 = vpop.permute.xlu0 %1880  ;;  %v790_v55 = vsel %vm758_vm0, %v2458_v46, %v1872_v39 }
 0x20d   : > { %v1888_v16 = vunpack.i.h.bf16 %v1886_v11  ;;  %v1887_v14 = vunpack.i.l.bf16 %v1886_v11  ;;  %v1883_v5 = vunpack.i.h.bf16 %v1881_v4  ;;  %v1882_v6 = vunpack.i.l.bf16 %v1881_v4 }
 0x20f   : > { %v764_v28 = vsel %vm758_vm0, %v2335_v61, %v1888_v16  ;;  %v763_v29 = vsel %vm758_vm0, %v2321_v49, %v1887_v14  ;;  %v789_v22 = vsel %vm758_vm0, %v2464_v50, %v1883_v5  ;;  %v788_v30 = vsel %vm758_vm0, %v2461_v48, %v1882_v6  ;;  %v1965_v16 = vld [vmem:[%s2687_s4] sm:$0xff]   ;;  %v1966_v14 = vld [vmem:[%s2687_s4 + $0x8] sm:$0xff]  }
 0x210   : > { %v1896_v21 = vpop.permute.xlu1 %1895  ;;  %v1891_v23 = vpop.permute.xlu0 %1890  ;;  %1755 = vmatpush3.bf16.msra.mxu1 %v1965_v16 }
 0x211   : > { %v1898_v24 = vunpack.i.h.bf16 %v1896_v21  ;;  %v1897_v18 = vunpack.i.l.bf16 %v1896_v21  ;;  %v1893_v25 = vunpack.i.h.bf16 %v1891_v23  ;;  %v1892_v26 = vunpack.i.l.bf16 %v1891_v23  ;;  %1756 = vmatprep.subr.bf16.mxu1 %v2032_v19  ;;  %v2552_v21 = vld [vmem:[%s2688_s5] ss:$0 sm:$0xff] }
 0x213   : > { %v771_v36 = vsel %vm393_vm4, %v763_v29, %v1897_v18  ;;  %v772_v37 = vsel %vm393_vm4, %v764_v28, %v1898_v24  ;;  %v796_v61 = vsel %vm393_vm4, %v788_v30, %v1892_v26  ;;  %v797_v49 = vsel %vm393_vm4, %v789_v22, %v1893_v25  ;;  %v2560_v29 = vld [vmem:[%s2690_s7] sm:$0xff] }
 0x214   : > { %v1911_v32 = vpop.permute.xlu1 %1910  ;;  %v1901_v33 = vpop.permute.xlu0 %1900  ;;  %1757 = vmatpush3.bf16.msra.mxu1 %v1966_v14 }
 0x215   : > { %v1913_v7 = vunpack.i.h.bf16 %v1911_v32  ;;  %v1912_v34 = vunpack.i.l.bf16 %v1911_v32  ;;  %v1903_v17 = vunpack.i.h.bf16 %v1901_v33  ;;  %v1902_v35 = vunpack.i.l.bf16 %v1901_v33 }
 0x217   : > { %v804_v63 = vsel %vm775_vm1, %v796_v61, %v1902_v35  ;;  %v805_v50 = vsel %vm775_vm1, %v797_v49, %v1903_v17  ;;  %v780_v48 = vsel %vm775_vm1, %v771_v36, %v1912_v34  ;;  %v781_v38 = vsel %vm775_vm1, %v772_v37, %v1913_v7 }
 0x218   : > { %v1916_v40 = vpop.permute.xlu1 %1915  ;;  %v1906_v41 = vpop.permute.xlu0 %1905  ;;  %v813_v0 = vpack.c.bf16 %v805_v50, %v804_v63  ;;  %v812_v42 = vpack.c.bf16 %v781_v38, %v780_v48 }
 0x219   : > { %v1918_v1 = vunpack.i.h.bf16 %v1916_v40  ;;  %v1917_v43 = vunpack.i.l.bf16 %v1916_v40  ;;  %v1908_v45 = vunpack.i.h.bf16 %v1906_v41  ;;  %v1907_v51 = vunpack.i.l.bf16 %v1906_v41 }
 0x21a   : > { %999 = vmatprep.mubr.bf16.mxu1 %v813_v0  ;;  %1265 = vmatprep.mubr.bf16.mxu0 %v813_v0 }
 0x21b   : > { %1000 = vmatmul.mubr.bf16.gmra.mrb[8].mxu1 %v812_v42  ;;  %1266 = vmatmul.mubr.bf16.gmra.mrb[16].mxu0 %v812_v42  ;;  %v774_v2 = vsel %vm393_vm4, %v766_v52, %v1918_v1  ;;  %v773_v58 = vsel %vm393_vm4, %v765_v60, %v1917_v43  ;;  %v798_v54 = vsel %vm393_vm4, %v790_v55, %v1907_v51 }
 0x21c   : > { %v1926_v8 = vpop.permute.xlu1 %1925  ;;  %v1921_v62 = vpop.permute.xlu0 %1920  ;;  %v799_v44 = vsel %vm393_vm4, %v791_v53, %v1908_v45  ;;  %vm1379_vm4 = vcmask 1042434  }
 0x21d   : > { %v1928_v56 = vunpack.i.h.bf16 %v1926_v8  ;;  %v1927_v20 = vunpack.i.l.bf16 %v1926_v8  ;;  %v1923_v47 = vunpack.i.h.bf16 %v1921_v62  ;;  %v1922_v57 = vunpack.i.l.bf16 %v1921_v62 }
 0x21f   : > { %v806_v9 = vsel %vm775_vm1, %v798_v54, %v1922_v57  ;;  %v807_v10 = vsel %vm775_vm1, %v799_v44, %v1923_v47  ;;  %v782_v46 = vsel %vm775_vm1, %v773_v58, %v1927_v20  ;;  %v783_v12 = vsel %vm775_vm1, %v774_v2, %v1928_v56 }
 0x220   : > { %v815_v11 = vpack.c.bf16 %v807_v10, %v806_v9  ;;  %v814_v4 = vpack.c.bf16 %v783_v12, %v782_v46 }
 0x222   : > { %1007 = vmatprep.mubr.bf16.mxu1 %v815_v11  ;;  %1273 = vmatprep.mubr.bf16.mxu0 %v815_v11 }
 0x223   : > { %1008 = vmatmul.mubr.bf16.gmra.mrb[12].mxu1 %v814_v4  ;;  %1274 = vmatmul.mubr.bf16.gmra.mrb[20].mxu0 %v814_v4 }
 0x224   : > { %1758 = vmatprep.mubr.msk.bf16.mxu1 %vm2036_vm2, %v2032_v19 }
 0x2d2   : > { %v1671_v5 = vpop.f32.mrb[0].mxu1  ;;  %v1711_v6 = vpop.f32.mrb[8].mxu0 }
 0x2d3   : > { %v1672_v23 = vpop.f32.mrb[1].mxu1  ;;  %v1712_v18 = vpop.f32.mrb[9].mxu0 }
 0x2d4   : > { %v1673_v24 = vadd.f32 %v1672_v23, %v1671_v5  ;;  %v1674_v25 = vpop.f32.mrb[2].mxu1  ;;  %v2554_v26 = vadd.f32 %v1712_v18, %v1711_v6  ;;  %v1714_v27 = vpop.f32.mrb[10].mxu0 }
 0x2d5   : > { %v1675_v15 = vpop.f32.mrb[3].mxu1  ;;  %v1715_v19 = vpop.f32.mrb[11].mxu0 }
 0x2d6   : > { %v986_v3 = vadd.f32 %v1673_v24, %v2552_v21  ;;  %v1676_v28 = vadd.f32 %v1675_v15, %v1674_v25  ;;  %v2562_v22 = vadd.f32 %v1715_v19, %v1714_v27 }
 0x2d8   : > { %v1016_v30 = vmax.f32 %v986_v3, 0.0  ;;  %v989_v32 = vadd.f32 %v1676_v28, %v2552_v21 }
 0x2da   : > { %v1025_v33 = vmul.f32 %v2560_v29, %v1016_v30  ;;  %v1017_v7 = vmax.f32 %v989_v32, 0.0 }
 0x2dc   : > { %v1033_v34 = vsel %vm758_vm0, %v1025_v33, -inf  ;;  %v1026_v17 = vmul.f32 %v2560_v29, %v1017_v7 }
 0x2dd   : > { %v1034_v35 = vrot.slane %v1033_v34, 4 }
 0x2de   : > { %v1040_v36 = vsel %vm758_vm0, %v1026_v17, -inf  ;;  %v1677_v37 = vpop.f32.mrb[4].mxu1  ;;  %v1717_v63 = vpop.f32.mrb[12].mxu0 }
 0x2df   : > { %v1035_v61 = vmax.f32 %v1033_v34, %v1034_v35  ;;  %v1041_v49 = vrot.slane %v1040_v36, 4  ;;  %v1678_v50 = vpop.f32.mrb[5].mxu1  ;;  %v1718_v38 = vpop.f32.mrb[13].mxu0 }
 0x2e0   : > { %v1679_v48 = vadd.f32 %v1678_v50, %v1677_v37  ;;  %v1680_v31 = vpop.f32.mrb[6].mxu1  ;;  %v1720_v41 = vpop.f32.mrb[14].mxu0  ;;  %v2570_v1 = vadd.f32 %v1718_v38, %v1717_v63 }
 0x2e1   : > { %v1036_v39 = vrot.slane %v1035_v61, 2  ;;  %v1042_v40 = vmax.f32 %v1040_v36, %v1041_v49  ;;  %v1681_v0 = vpop.f32.mrb[7].mxu1  ;;  %v1721_v45 = vpop.f32.mrb[15].mxu0 }
 0x2e2   : > { %v994_v42 = vadd.f32 %v1679_v48, %v2552_v21  ;;  %v1682_v43 = vadd.f32 %v1681_v0, %v1680_v31  ;;  %v2573_v53 = vadd.f32 %v1721_v45, %v1720_v41 }
 0x2e3   : > { %v1037_v51 = vmax.f32 %v1035_v61, %v1036_v39  ;;  %v1043_v59 = vrot.slane %v1042_v40, 2 }
 0x2e4   : > { %v1018_v52 = vmax.f32 %v994_v42, 0.0  ;;  %v997_v60 = vadd.f32 %v1682_v43, %v2552_v21 }
 0x2e5   : > { %v1038_v55 = vrot.slane %v1037_v51, 1  ;;  %v1044_v8 = vmax.f32 %v1042_v40, %v1043_v59 }
 0x2e6   : > { %v1027_v62 = vmul.f32 %v2560_v29, %v1018_v52  ;;  %v1019_v56 = vmax.f32 %v997_v60, 0.0 }
 0x2e7   : > { %v1039_v20 = vmax.f32 %v1037_v51, %v1038_v55  ;;  %v1045_v47 = vrot.slane %v1044_v8, 1 }
 0x2e8   : > { %v1047_v57 = vsel %vm758_vm0, %v1027_v62, -inf  ;;  %v1028_v2 = vmul.f32 %v2560_v29, %v1019_v56 }
 0x2e9   : > { %v1349_v58 = vpack.c.bf16 %v1039_v20, %v1039_v20  ;;  %v1046_v54 = vmax.f32 %v1044_v8, %v1045_v47  ;;  %v1048_v44 = vrot.slane %v1047_v57, 4 }
 0x2ea   : > { %v1054_v9 = vsel %vm758_vm0, %v1028_v2, -inf }
 0x2eb   : > { %v1350_v10 = vpack.c.bf16 %v1046_v54, %v1046_v54  ;;  %v1049_v46 = vmax.f32 %v1047_v57, %v1048_v44  ;;  %v1055_v12 = vrot.slane %v1054_v9, 4  ;;  %v1369_v11 = vunpack.c.l.b16 %v1349_v58 }
 0x2ed   : > { %v1370_v4 = vunpack.c.l.b16 %v1350_v10  ;;  %v1050_v16 = vrot.slane %v1049_v46, 2  ;;  %v1056_v14 = vmax.f32 %v1054_v9, %v1055_v12 }
 0x2ee   : > { %v1683_v5 = vpop.f32.mrb[8].mxu1  ;;  %v1723_v18 = vpop.f32.mrb[16].mxu0 }
 0x2ef   : > { %v1378_v6 = vsel %vm1377_vm3, %v1370_v4, %v1369_v11  ;;  %v1051_v23 = vmax.f32 %v1049_v46, %v1050_v16  ;;  %v1057_v24 = vrot.slane %v1056_v14, 2  ;;  %v1684_v25 = vpop.f32.mrb[9].mxu1  ;;  %v1724_v15 = vpop.f32.mrb[17].mxu0 }
 0x2f0   : > { %v1685_v27 = vadd.f32 %v1684_v25, %v1683_v5  ;;  %v1686_v3 = vpop.f32.mrb[10].mxu1  ;;  %v2580_v30 = vadd.f32 %v1724_v15, %v1723_v18  ;;  %v1726_v32 = vpop.f32.mrb[18].mxu0 }
 0x2f1   : > { %v1052_v28 = vrot.slane %v1051_v23, 1  ;;  %v1058_v19 = vmax.f32 %v1056_v14, %v1057_v24  ;;  %v1687_v33 = vpop.f32.mrb[11].mxu1  ;;  %v1727_v17 = vpop.f32.mrb[19].mxu0 }
 0x2f2   : > { %v1002_v7 = vadd.f32 %v1685_v27, %v2552_v21  ;;  %v1688_v34 = vadd.f32 %v1687_v33, %v1686_v3  ;;  %v2583_v37 = vadd.f32 %v1727_v17, %v1726_v32 }
 0x2f3   : > { %v1053_v35 = vmax.f32 %v1051_v23, %v1052_v28  ;;  %v1059_v36 = vrot.slane %v1058_v19, 1 }
 0x2f4   : > { %v1020_v61 = vmax.f32 %v1002_v7, 0.0  ;;  %v1005_v49 = vadd.f32 %v1688_v34, %v2552_v21 }
 0x2f5   : > { %v1351_v63 = vpack.c.bf16 %v1053_v35, %v1053_v35  ;;  %v1060_v50 = vmax.f32 %v1058_v19, %v1059_v36 }
 0x2f6   : > { %v1029_v48 = vmul.f32 %v2560_v29, %v1020_v61  ;;  %v1021_v38 = vmax.f32 %v1005_v49, 0.0  ;;  %v1689_v31 = vpop.f32.mrb[12].mxu1  ;;  %v1729_v41 = vpop.f32.mrb[20].mxu0 }
 0x2f7   : > { %v1371_v39 = vunpack.c.l.b16 %v1351_v63  ;;  %v1352_v40 = vpack.c.bf16 %v1060_v50, %v1060_v50  ;;  %v1690_v0 = vpop.f32.mrb[13].mxu1  ;;  %v1730_v51 = vpop.f32.mrb[21].mxu0 }
 0x2f8   : > { %v1061_v42 = vsel %vm758_vm0, %v1029_v48, -inf  ;;  %v1030_v43 = vmul.f32 %v2560_v29, %v1021_v38  ;;  %v1691_v45 = vadd.f32 %v1690_v0, %v1689_v31  ;;  %v1692_v59 = vpop.f32.mrb[14].mxu1  ;;  %v1732_v8 = vpop.f32.mrb[22].mxu0  ;;  %v1731_v47 = vadd.f32 %v1730_v51, %v1729_v41 }
 0x2f9   : > { %v1380_v52 = vsel %vm1379_vm4, %v1371_v39, %v1378_v6  ;;  %v1372_v60 = vunpack.c.l.b16 %v1352_v40  ;;  %v1062_v55 = vrot.slane %v1061_v42, 4  ;;  %v1693_v62 = vpop.f32.mrb[15].mxu1  ;;  %v1733_v57 = vpop.f32.mrb[23].mxu0  ;;  %v1283_v51 = vshrl.u32 %v315_v13, 7 }
 0x2fa   : > { %v1068_v56 = vsel %vm758_vm0, %v1030_v43, -inf  ;;  %v1010_v20 = vadd.f32 %v1691_v45, %v2552_v21  ;;  %v1694_v9 = vadd.f32 %v1693_v62, %v1692_v59  ;;  %v1734_v14 = vadd.f32 %v1733_v57, %v1732_v8 }
 0x2fb   : > { %v1382_v2 = vsel %vm1381_vm5, %v1372_v60, %v1380_v52  ;;  %v1063_v58 = vmax.f32 %v1061_v42, %v1062_v55  ;;  %v1069_v54 = vrot.slane %v1068_v56, 4  ;;  %vm1284_vm10 = vcmp.eq.s32.totalorder %v1283_v51, 0 }
 0x2fc   : > { %v1022_v44 = vmax.f32 %v1010_v20, 0.0  ;;  %v1013_v11 = vadd.f32 %v1694_v9, %v2552_v21  ;;  %v1285_v59 = vsel %vm1284_vm10, %v2554_v26, 0.0  ;;  %v1286_v52 = vsel %vm1284_vm10, %v2562_v22, 0.0 }
 0x2fd   : > { %v1064_v10 = vrot.slane %v1063_v58, 2  ;;  %v1070_v46 = vmax.f32 %v1068_v56, %v1069_v54  ;;  %v1287_v60 = vsel %vm1284_vm10, %v2570_v1, 0.0  ;;  %v1288_v55 = vsel %vm1284_vm10, %v2573_v53, 0.0 }
 0x2fe   : > { %v1031_v12 = vmul.f32 %v2560_v29, %v1022_v44  ;;  %v1023_v6 = vmax.f32 %v1013_v11, 0.0  ;;  %v1289_v8 = vsel %vm1284_vm10, %v2580_v30, 0.0  ;;  %v1290_v62 = vsel %vm1284_vm10, %v2583_v37, 0.0 }
 0x2ff   : > { %v1065_v4 = vmax.f32 %v1063_v58, %v1064_v10  ;;  %v1071_v16 = vrot.slane %v1070_v46, 2  ;;  %v1291_v56 = vsel %vm1284_vm10, %v1731_v47, 0.0  ;;  %v1292_v20 = vsel %vm1284_vm10, %v1734_v14, 0.0 }
 0x300   : > { %v1075_v5 = vsel %vm758_vm0, %v1031_v12, -inf  ;;  %v1032_v25 = vmul.f32 %v2560_v29, %v1023_v6  ;;  %v1293_v57 = vsel %vm758_vm0, %v1285_v59, 0.0  ;;  %v1307_v13 = vsel %vm758_vm0, %v1287_v60, 0.0 }
 0x301   : > { %v1066_v23 = vrot.slane %v1065_v4, 1  ;;  %v1072_v24 = vmax.f32 %v1070_v46, %v1071_v16  ;;  %v1076_v18 = vrot.slane %v1075_v5, 4  ;;  %v1314_v26 = vsel %vm758_vm0, %v1288_v55, 0.0 }
 0x302   : > { %v1082_v28 = vsel %vm758_vm0, %v1032_v25, -inf  ;;  %v1321_v22 = vsel %vm758_vm0, %v1289_v8, 0.0  ;;  %v1328_v1 = vsel %vm758_vm0, %v1290_v62, 0.0  ;;  %v1335_v53 = vsel %vm758_vm0, %v1291_v56, 0.0 }
 0x303   : > { %v1067_v27 = vmax.f32 %v1065_v4, %v1066_v23  ;;  %v1073_v15 = vrot.slane %v1072_v24, 1  ;;  %v1077_v3 = vmax.f32 %v1075_v5, %v1076_v18  ;;  %v1083_v21 = vrot.slane %v1082_v28, 4 }
 0x304   : > { %v1342_v30 = vsel %vm758_vm0, %v1292_v20, 0.0  ;;  %v1294_v58 = vrot.slane %v1293_v57, 4  ;;  %v1308_v47 = vrot.slane %v1307_v13, 4  ;;  %v1315_v54 = vrot.slane %v1314_v26, 4 }
 0x305   : > { %v1353_v19 = vpack.c.bf16 %v1067_v27, %v1067_v27  ;;  %v1074_v32 = vmax.f32 %v1072_v24, %v1073_v15  ;;  %v1078_v33 = vrot.slane %v1077_v3, 2  ;;  %v1084_v35 = vmax.f32 %v1082_v28, %v1083_v21 }
 0x306   : > { %v1322_v44 = vrot.slane %v1321_v22, 4  ;;  %v1329_v9 = vrot.slane %v1328_v1, 4  ;;  %v1336_v10 = vrot.slane %v1335_v53, 4  ;;  %v1343_v46 = vrot.slane %v1342_v30, 4 }
 0x307   : > { %v1373_v7 = vunpack.c.l.b16 %v1353_v19  ;;  %v1354_v34 = vpack.c.bf16 %v1074_v32, %v1074_v32  ;;  %v1079_v17 = vmax.f32 %v1077_v3, %v1078_v33  ;;  %v1085_v29 = vrot.slane %v1084_v35, 2 }
 0x308   : > { %v1295_v12 = vadd.f32 %v1294_v58, %v1293_v57  ;;  %v1309_v4 = vadd.f32 %v1308_v47, %v1307_v13  ;;  %v1316_v16 = vadd.f32 %v1315_v54, %v1314_v26  ;;  %v1323_v14 = vadd.f32 %v1322_v44, %v1321_v22 }
 0x309   : > { %v1384_v36 = vsel %vm1383_vm6, %v1373_v7, %v1382_v2  ;;  %v1374_v61 = vunpack.c.l.b16 %v1354_v34  ;;  %v1080_v49 = vrot.slane %v1079_v17, 1  ;;  %v1086_v48 = vmax.f32 %v1084_v35, %v1085_v29 }
 0x30a   : > { %v1300_v2 = vsel %vm758_vm0, %v1286_v52, 0.0  ;;  %v1330_v5 = vadd.f32 %v1329_v9, %v1328_v1  ;;  %v1337_v6 = vadd.f32 %v1336_v10, %v1335_v53  ;;  %v1344_v23 = vadd.f32 %v1343_v46, %v1342_v30  ;;  %v1642_v52 = vld [vmem:[%s2689_s6] ss:$0 sm:$0xff] }
 0x30b   : > { %v1386_v63 = vsel %vm1385_vm7, %v1374_v61, %v1384_v36  ;;  %v1081_v50 = vmax.f32 %v1079_v17, %v1080_v49  ;;  %v1087_v31 = vrot.slane %v1086_v48, 1  ;;  %v1301_v37 = vrot.slane %v1300_v2, 4 }
 0x30c   : > { %v1296_v24 = vrot.slane %v1295_v12, 2  ;;  %v1310_v25 = vrot.slane %v1309_v4, 2  ;;  %v1317_v27 = vrot.slane %v1316_v16, 2  ;;  %v1324_v15 = vrot.slane %v1323_v14, 2 }
 0x30d   : > { %v1355_v38 = vpack.c.bf16 %v1081_v50, %v1081_v50  ;;  %v1088_v40 = vmax.f32 %v1086_v48, %v1087_v31  ;;  %v1302_v11 = vadd.f32 %v1301_v37, %v1300_v2  ;;  %v1331_v3 = vrot.slane %v1330_v5, 2 }
 0x30e   : > { %v1338_v28 = vrot.slane %v1337_v6, 2  ;;  %v1345_v19 = vrot.slane %v1344_v23, 2  ;;  %v1297_v32 = vadd.f32 %v1296_v24, %v1295_v12  ;;  %v1311_v21 = vadd.f32 %v1310_v25, %v1309_v4 }
 0x30f   : > { %v1375_v39 = vunpack.c.l.b16 %v1355_v38  ;;  %v1356_v0 = vpack.c.bf16 %v1088_v40, %v1088_v40  ;;  %v1303_v18 = vrot.slane %v1302_v11, 2  ;;  %v1318_v7 = vadd.f32 %v1317_v27, %v1316_v16 }
 0x310   : > { %v1325_v34 = vadd.f32 %v1324_v15, %v1323_v14  ;;  %v1332_v17 = vadd.f32 %v1331_v3, %v1330_v5  ;;  %v1339_v35 = vadd.f32 %v1338_v28, %v1337_v6  ;;  %v1346_v36 = vadd.f32 %v1345_v19, %v1344_v23 }
 0x311   : > { %v1388_v41 = vsel %vm1387_vm8, %v1375_v39, %v1386_v63  ;;  %v1376_v42 = vunpack.c.l.b16 %v1356_v0  ;;  %v1304_v33 = vadd.f32 %v1303_v18, %v1302_v11  ;;  %v1298_v61 = vrot.slane %v1297_v32, 1 }
 0x312   : > { %v1312_v29 = vrot.slane %v1311_v21, 1  ;;  %v1319_v63 = vrot.slane %v1318_v7, 1  ;;  %v1326_v50 = vrot.slane %v1325_v34, 1  ;;  %v1333_v48 = vrot.slane %v1332_v17, 1 }
 0x313   : > { %v1390_v43 = vsel %vm1389_vm9, %v1376_v42, %v1388_v41  ;;  %v1305_v49 = vrot.slane %v1304_v33, 1  ;;  %v1340_v38 = vrot.slane %v1339_v35, 1  ;;  %v1347_v31 = vrot.slane %v1346_v36, 1 }
 0x314   : > { %v1391_v45 = vpack.c.b16 %v1390_v43, %v1390_v43  ;;  %v1299_v39 = vadd.f32 %v1298_v61, %v1297_v32  ;;  %v1313_v41 = vadd.f32 %v1312_v29, %v1311_v21  ;;  %v1320_v0 = vadd.f32 %v1319_v63, %v1318_v7 }
 0x315   : > { %v1306_v40 = vadd.f32 %v1305_v49, %v1304_v33  ;;  %v1327_v42 = vadd.f32 %v1326_v50, %v1325_v34  ;;  %v1334_v43 = vadd.f32 %v1333_v48, %v1332_v17  ;;  %v1348_v51 = vadd.f32 %v1347_v31, %v1346_v36 }
 0x316   : > { %1759 = vmatmul.mubr.msk.bf16.vlgmr.msra.gmra.mrb[16].mxu1 %vm758_vm0, %v1391_v45  ;;  %v1341_v45 = vadd.f32 %v1340_v38, %v1339_v35 }
 0x3e9   : > { %v1441_v59 = vpop.f32.mrb[16].mxu1 }
 0x3ea   : > { %v1448_v60 = vrot.slane %v1441_v59, 1  ;;  %v1449_v55 = vrot.slane %v1441_v59, 2  ;;  %v1450_v8 = vrot.slane %v1441_v59, 3  ;;  %v1451_v62 = vrot.slane %v1441_v59, 4  ;;  %v1760_v56 = vpop.f32.mrb[17].mxu1 }
 0x3eb   : > { %v1463_v20 = vadd.f32 %v1441_v59, %v1299_v39  ;;  %v1444_v57 = vpop.f32.mrb[18].mxu1  ;;  %v1452_v2 = vrot.slane %v1441_v59, 5  ;;  %v1453_v13 = vrot.slane %v1441_v59, 6  ;;  %v1454_v26 = vrot.slane %v1441_v59, 7 }
 0x3ec   : > { %v1464_v22 = vadd.f32 %v1448_v60, %v1306_v40  ;;  %v1465_v1 = vadd.f32 %v1449_v55, %v1313_v41  ;;  %v1466_v53 = vadd.f32 %v1450_v8, %v1320_v0  ;;  %v1761_v30 = vpop.f32.mrb[19].mxu1  ;;  %v1467_v58 = vadd.f32 %v1451_v62, %v1327_v42 }
 0x3ed   : > { %v1478_v37 = vadd.f32 %v1642_v52, %v1463_v20  ;;  %v1468_v47 = vadd.f32 %v1452_v2, %v1334_v43  ;;  %v1469_v54 = vadd.f32 %v1453_v13, %v1341_v45  ;;  %v1470_v44 = vadd.f32 %v1454_v26, %v1348_v51 }
 0x3ee   : > { %v1479_v9 = vadd.f32 %v1642_v52, %v1464_v22  ;;  %v1480_v10 = vadd.f32 %v1642_v52, %v1465_v1  ;;  %v1481_v46 = vadd.f32 %v1642_v52, %v1466_v53  ;;  %v1482_v12 = vadd.f32 %v1642_v52, %v1467_v58 }
 0x3ef   : > { %v1483_v11 = vadd.f32 %v1642_v52, %v1468_v47  ;;  %v1484_v4 = vadd.f32 %v1642_v52, %v1469_v54  ;;  %v1485_v16 = vadd.f32 %v1642_v52, %v1470_v44  ;;  %v1486_v24 = vmax.f32 %v1478_v37, 0.0 }
 0x3f0   : > { %v1487_v14 = vmax.f32 %v1479_v9, 0.0  ;;  %v1488_v5 = vmax.f32 %v1480_v10, 0.0  ;;  %v1489_v6 = vmax.f32 %v1481_v46, 0.0  ;;  %v1490_v23 = vmax.f32 %v1482_v12, 0.0 }
 0x3f1   : > { %v1491_v18 = vmax.f32 %v1483_v11, 0.0  ;;  %v1492_v15 = vmax.f32 %v1484_v4, 0.0  ;;  %v1493_v3 = vmax.f32 %v1485_v16, 0.0 }
 0x3f2   : > { %v1502_v25 = vrot.slane %v1487_v14, 7  ;;  %v1504_v27 = vrot.slane %v1488_v5, 6  ;;  %v1506_v19 = vrot.slane %v1489_v6, 5  ;;  %v1508_v33 = vrot.slane %v1490_v23, 4 }
 0x3f3   : > { %v1510_v7 = vrot.slane %v1491_v18, 3  ;;  %v1512_v17 = vrot.slane %v1492_v15, 2  ;;  %v1514_v36 = vrot.slane %v1493_v3, 1 }
 0x3f4   : > { %v1503_v28 = vsel %vm1377_vm3, %v1502_v25, %v1486_v24 }
 0x3f5   : > { %v1505_v32 = vsel %vm1379_vm4, %v1504_v27, %v1503_v28 }
 0x3f6   : > { %v1507_v21 = vsel %vm1381_vm5, %v1506_v19, %v1505_v32 }
 0x3f7   : > { %v1509_v34 = vsel %vm1383_vm6, %v1508_v33, %v1507_v21 }
 0x3f8   : > { %v1511_v35 = vsel %vm1385_vm7, %v1510_v7, %v1509_v34 }
 0x3f9   : > { %v1513_v61 = vsel %vm1387_vm8, %v1512_v17, %v1511_v35 }
 0x3fa   : > { %v1515_v49 = vsel %vm1389_vm9, %v1514_v36, %v1513_v61 }
 0x3fb   : > { %1517 = vst.msk [vmem:[%s299_s19] sm:$0xff] %vm758_vm0, %v1515_v49 }
 0x3fc   : > { %1980 = shalt.err (!%p1977_p3)
}
 0x3fd   : > { %s1981_s12 = scalar_lea.hbm %s2637_s23, 128  ;;  %s1985_s18 = scalar_lea.hbm %s2691_s8, 256 }
 0x3fe   : > { %p1982_p4 = scmp.ne.s32.totalorder %s2637_s23, %s1981_s12  ;;  %p1986_p9 = scmp.lt.u32.totalorder %s2637_s23, %s2691_s8 }
 0x3ff   : > { %p1987_p10 = scmp.lt.u32.totalorder %s1985_s18, %s1981_s12  ;;  %p1989_p12 = scmp.lt.u32.totalorder %s1981_s12, %s2637_s23 }
 0x400   : > { %p1983_p7 = pnand %p1982_p4, %p2121_p5 }
 0x401   : > { %p1988_p11 = por %p1987_p10, %p1986_p9 }
 0x402   : > { %p1984_p8 = pneg %p1983_p7 }
 0x403   : > { %p1990_p13 = por %p1989_p12, %p1988_p11 }
 0x405   : > { %p1991_p0 = pnand %p1990_p13, %p1984_p8 }
 0x407   : > { %1994 = shalt.err (!%p1991_p0)
}
 0x408   : > { %1762 = dma.vmem_to_hbm [thread:$0]  (%p2121_p5), %s2639_s20, 128, %s2637_s23, %s1519_s9  }
 0x409 PF: > { %p1768_p1 = scmp.ge.s32.totalorder %s2029_s30, 2  ;;  %s1544_s22 = sand.u32 1, %s2017_s27  }
 0x40a   : > { %s1545_s24 = scalar_lea.sflag [#allocation3], %s1544_s22 }
 0x40b   : > { %p1765_p2 = pnand %p1768_p1, %p2125_p6 }
 0x40d   : > { %2012 = dma.done.wait (!%p1765_p2), %s1545_s24, 128  }
 0x40e   : > { %2014 = vsyncadd (!%p1765_p2), %s1545_s24, 4294967168  ;;  %p18_p3 = scmp.ge.s32.totalorder %s2108_s11, 4   ;;  %s2694_s27 = smov %s2021_s28 }
 0x40f   : > { %s2695_s28 = smov %s2025_s29  ;;  %s2696_s29 = smov %s2119_s14 }
 0x410   : > { %s2697_s30 = smov %s2108_s11  ;;  %20 = sbr.rel (!%p18_p3) target bundleno = 3 (0x3), region = 87 }
 0x417   :  { %1550 = vsyncpa [#allocation3], 1 }
 0x418   :  { %1552 = vsyncpa [#allocation3 + $0x1], 1 }

</bundles_post_ra>
